<compile_context>
chip_gen: v6e
topology: v6e:2x2x1
jax: 0.10.0
libtpu: 0.0.40
codegen_flags: <defaults>
</compile_context>

<pallas_src>
import functools

import jax
import jax.numpy as jnp
import numpy as np
from jax.experimental import pallas as pl
from jax.experimental.pallas import tpu as pltpu


def _gelu_exact(x):
    # nn.GELU() default: x * 0.5 * (1 + erf(x / sqrt(2))).
    # erf via Abramowitz & Stegun 7.1.26 polynomial (|abs err| < 1.5e-7, i.e.
    # f32-exact).  The true divide is kept (pl.reciprocal(approx=True) would
    # move it to the EUP slot but adds ~1e-4 error, breaking tight parity).
    a1, a2, a3, a4, a5 = 0.254829592, -0.284496736, 1.421413741, -1.453152027, 1.061405429
    p = 0.3275911
    z = jnp.abs(x) * 0.7071067811865476
    t = 1.0 / (1.0 + p * z)
    poly = ((((a5 * t + a4) * t + a3) * t + a2) * t + a1) * t
    q = 0.5 * poly * jnp.exp(-z * z)          # 0.5 * (1 - erf(|x|/sqrt(2)))
    phi = jnp.where(x >= 0.0, 1.0 - q, q)     # Phi(x) = 0.5 * (1 + erf(x/sqrt(2)))
    return x * phi


def _fusioner_kernel(x_ref, xt_ref, xb_ref, w1_ref, b1_ref, lnw_ref, lnb_ref,
                     dww_ref, dwb_ref, w2_ref, b2_ref, o_ref, *, compute_dtype):
    TH, W, C = x_ref.shape[1], x_ref.shape[2], x_ref.shape[3]
    K = w1_ref.shape[1]                                   # 4*C

    i = pl.program_id(1)
    top_ok = (i > 0).astype(jnp.float32)                  # halo row above is inside the image?
    bot_ok = (i < pl.num_programs(1) - 1).astype(jnp.float32)

    x_mid = x_ref[0].astype(jnp.float32)                  # (TH, W, C)
    x_top = xt_ref[0].astype(jnp.float32)                 # (1, W, C)  row i*TH-1 (clamped)
    x_bot = xb_ref[0].astype(jnp.float32)                 # (1, W, C)  row (i+1)*TH (clamped)
    xt = jnp.concatenate([x_top, x_mid, x_bot], axis=0)   # (TH+2, W, C)

    P = (TH + 2) * W
    xf = xt.reshape(P, C)

    # ---- 1x1 conv (pointwise) on the MXU ----
    h = jnp.dot(xf.astype(compute_dtype), w1_ref[...],
                preferred_element_type=jnp.float32) + b1_ref[0][None, :]

    # ---- channels_first LayerNorm == per-pixel LN over channels (one-pass moments) ----
    mu = jnp.mean(h, axis=-1, keepdims=True)
    var = jnp.mean(h * h, axis=-1, keepdims=True) - mu * mu
    inv = jax.lax.rsqrt(var + 1e-6)
    h = (h - mu) * inv * lnw_ref[0][None, :] + lnb_ref[0][None, :]

    h = h.reshape(TH + 2, W, K)

    # Zero the halo rows that fall outside the image (== depthwise zero padding).
    # Per-pixel conv1+LN of valid neighbour rows is recomputed exactly, so interior
    # tiles match the full-image result bit-for-bit.
    h = jnp.concatenate([h[0:1] * top_ok, h[1:TH + 1], h[TH + 1:TH + 2] * bot_ok], axis=0)

    # ---- depthwise 3x3, stride 1, zero padding 1 ----
    # Horizontal neighbours: two zero-filled shifted copies (the only realignment work).
    zcol = jnp.zeros((TH + 2, 1, K), jnp.float32)
    h_l = jnp.concatenate([zcol, h[:, :W - 1, :]], axis=1)   # h_l[:, x] = h[:, x-1]
    h_r = jnp.concatenate([h[:, 1:, :], zcol], axis=1)       # h_r[:, x] = h[:, x+1]
    srcs = (h_l, h, h_r)                                     # kx = 0, 1, 2

    dw = dww_ref[...]                                        # (9, K), index = ky*3 + kx
    # Vertical offsets are plain leading-dim slices (free).  Start with the centre tap.
    acc = h[1:TH + 1] * dw[4][None, None, :] + dwb_ref[0][None, None, :]
    for ky in range(3):
        for kx in range(3):
            if ky == 1 and kx == 1:
                continue
            acc = acc + srcs[kx][ky:ky + TH] * dw[ky * 3 + kx][None, None, :]

    # ---- GELU (exact, erf-based) ----
    acc = _gelu_exact(acc)

    # ---- 1x1 conv back to C channels (gamma already folded into w2/b2) ----
    y = jnp.dot(acc.reshape(TH * W, K).astype(compute_dtype), w2_ref[...],
                preferred_element_type=jnp.float32) + b2_ref[0][None, :]

    # ---- residual ----
    o_ref[0] = (x_mid + y.reshape(TH, W, C)).astype(o_ref.dtype)


def _pick_tile_h(H, W, K, budget_bytes=4 * 2**20):
    """Largest divisor of H whose ~6 live (TH+2, W, 4C) f32 intermediates fit the budget."""
    per_row_bytes = W * K * 4
    for th in range(H, 0, -1):
        if H % th:
            continue
        if 6 * (th + 2) * per_row_bytes <= budget_bytes:
            return th
    return 1


def fusioner_block_nhwc(x, params, *, tile_h=None, compute_dtype=jnp.float32):
    """x: (N, H, W, C) float32, channels-last.  Returns (N, H, W, C)."""
    w1, b1, lnw, lnb, dww, dwb, w2, b2, gamma = params
    N, H, W, C = x.shape
    K = w1.shape[1]

    # Fold the per-output-channel layer scale into the second pointwise conv.
    w2f = (w2 * gamma).astype(compute_dtype)                 # (K, C) * (1, C)
    b2f = (b2 * gamma).astype(jnp.float32)
    w1f = w1.astype(compute_dtype)

    TH = int(tile_h) if tile_h is not None else _pick_tile_h(H, W, K)
    if H % TH != 0:                                          # fall back to a divisor of H
        TH = max(d for d in range(1, TH + 1) if H % d == 0)
    n_th = H // TH

    def wgt(shape):
        return pl.BlockSpec(shape, lambda n, i: (0,) * len(shape))

    # Size the scoped VMEM to the tile (with headroom), capped below v7x physical VMEM.
    tile_bytes = (TH + 2) * W * K * 4
    vmem_limit = int(min(64 * 2**20, max(16 * 2**20, 12 * tile_bytes)))

    kern = functools.partial(_fusioner_kernel, compute_dtype=compute_dtype)

    out = pl.pallas_call(
        kern,
        out_shape=jax.ShapeDtypeStruct((N, H, W, C), x.dtype),
        grid=(N, n_th),
        in_specs=[
            # main slab of TH rows
            pl.BlockSpec((1, TH, W, C), lambda n, i: (n, i, 0, 0)),
            # 1-row halos (block size 1 => block index == row index); clamped at the
            # image border and masked inside the kernel.
            pl.BlockSpec((1, 1, W, C), lambda n, i: (n, jnp.maximum(i * TH - 1, 0), 0, 0)),
            pl.BlockSpec((1, 1, W, C), lambda n, i: (n, jnp.minimum((i + 1) * TH, H - 1), 0, 0)),
            wgt((C, K)), wgt((1, K)),        # conv1 w, b
            wgt((1, K)), wgt((1, K)),        # layernorm w, b
            wgt((9, K)), wgt((1, K)),        # depthwise w (ky*3+kx, K), b
            wgt((K, C)), wgt((1, C)),        # conv2 w, b (gamma folded)
        ],
        out_specs=pl.BlockSpec((1, TH, W, C), lambda n, i: (n, i, 0, 0)),
        compiler_params=pltpu.CompilerParams(
            dimension_semantics=("parallel", "parallel"),
            vmem_limit_bytes=vmem_limit),
    )(x, x, x, w1f, b1, lnw, lnb, dww, dwb, w2f, b2f)
    return out


def fusioner_block(x_nchw, params, *, tile_h=None, compute_dtype=jnp.float32):
    """NCHW wrapper matching the PyTorch module.  Prefer fusioner_block_nhwc and keep
    the surrounding network channels-last: these two transposes are HBM round trips."""
    x = jnp.transpose(x_nchw, (0, 2, 3, 1)).astype(jnp.float32)
    y = fusioner_block_nhwc(x, params, tile_h=tile_h, compute_dtype=compute_dtype)
    return jnp.transpose(y, (0, 3, 1, 2)).astype(x_nchw.dtype)


def reference_forward(x_nchw, params):
    """Pure-JAX reference with the module's exact semantics (for the correctness check)."""
    w1, b1, lnw, lnb, dww, dwb, w2, b2, gamma = params
    x = jnp.transpose(x_nchw, (0, 2, 3, 1)).astype(jnp.float32)
    N, H, W, C = x.shape
    h = jnp.einsum('nhwc,ck->nhwk', x, w1) + b1[0]
    mu = h.mean(-1, keepdims=True)
    var = ((h - mu) ** 2).mean(-1, keepdims=True)
    h = (h - mu) / jnp.sqrt(var + 1e-6) * lnw[0] + lnb[0]
    hp = jnp.pad(h, ((0, 0), (1, 1), (1, 1), (0, 0)))
    acc = jnp.zeros_like(h)
    for ky in range(3):
        for kx in range(3):
            acc = acc + hp[:, ky:ky + H, kx:kx + W, :] * dww[ky * 3 + kx]
    acc = jax.nn.gelu(acc + dwb[0], approximate=False)
    y = jnp.einsum('nhwk,kc->nhwc', acc, w2) + b2[0]
    y = x + y * gamma[0]
    return jnp.transpose(y, (0, 3, 1, 2)).astype(x_nchw.dtype)


def init_params(key, C, layer_scale_init_value=1e-6):
    """Synthetic parameters, already in the kernel's (C_in, C_out) layout.

    Porting real PyTorch weights: Conv2d weight (C_out, C_in, 1, 1) -> squeeze and
    transpose to (C_in, C_out); depthwise weight (4C, 1, 3, 3) -> (3, 3, 4C) -> (9, 4C)."""
    K = 4 * C
    ks = jax.random.split(key, 8)
    w1 = 0.1 * jax.random.normal(ks[0], (C, K), jnp.float32)
    b1 = 0.1 * jax.random.normal(ks[1], (1, K), jnp.float32)
    lnw = 1.0 + 0.1 * jax.random.normal(ks[2], (1, K), jnp.float32)
    lnb = 0.1 * jax.random.normal(ks[3], (1, K), jnp.float32)
    dww = 0.1 * jax.random.normal(ks[4], (9, K), jnp.float32)
    dwb = 0.1 * jax.random.normal(ks[5], (1, K), jnp.float32)
    w2 = 0.1 * jax.random.normal(ks[6], (K, C), jnp.float32)
    b2 = 0.1 * jax.random.normal(ks[7], (1, C), jnp.float32)
    gamma = jnp.full((1, C), layer_scale_init_value, jnp.float32)
    return (w1, b1, lnw, lnb, dww, dwb, w2, b2, gamma)


if __name__ == "__main__":
    key = jax.random.PRNGKey(0)
    kx, kp = jax.random.split(key)
    N, C, H, W = 2, 4, 16, 16
    x = jax.random.normal(kx, (N, C, H, W), jnp.float32)        # NCHW, like the PyTorch module

    # gamma is a learnable parameter; use a non-trivial value here so the check
    # actually exercises the block path (the module's init value is 1e-6).
    params = init_params(kp, C, layer_scale_init_value=0.1)
    ref = jax.block_until_ready(reference_forward(x, params))

    # Cover interior tiles (both halos valid), edge tiles, and the single-tile case.
    for th in (4, 8, 16):
        out = jax.block_until_ready(fusioner_block(x, params, tile_h=th))
        assert out.shape == x.shape and out.dtype == x.dtype
        np.testing.assert_allclose(np.asarray(out), np.asarray(ref), atol=1e-5, rtol=1e-5)

    # Also check the auto-tile path with the module's default 1e-6 layer-scale init.
    params_default = init_params(kp, C)
    out = jax.block_until_ready(fusioner_block(x, params_default))
    np.testing.assert_allclose(np.asarray(out),
                               np.asarray(reference_forward(x, params_default)),
                               atol=1e-5, rtol=1e-5)

    print("KERNEL_OK")
</pallas_src>

<mosaic_0001>
module attributes {stable_mosaic.version = 11 : i64} {
  func.func @_fusioner_kernel(%arg0: i32, %arg1: i32, %arg2: memref<1x4x16x4xf32, #tpu.memory_space<vmem>>, %arg3: memref<1x1x16x4xf32, #tpu.memory_space<vmem>>, %arg4: memref<1x1x16x4xf32, #tpu.memory_space<vmem>>, %arg5: memref<4x16xf32, #tpu.memory_space<vmem>>, %arg6: memref<1x16xf32, #tpu.memory_space<vmem>>, %arg7: memref<1x16xf32, #tpu.memory_space<vmem>>, %arg8: memref<1x16xf32, #tpu.memory_space<vmem>>, %arg9: memref<9x16xf32, #tpu.memory_space<vmem>>, %arg10: memref<1x16xf32, #tpu.memory_space<vmem>>, %arg11: memref<16x4xf32, #tpu.memory_space<vmem>>, %arg12: memref<1x4xf32, #tpu.memory_space<vmem>>, %arg13: memref<1x4x16x4xf32, #tpu.memory_space<vmem>>) attributes {dimension_semantics = [#tpu.dimension_semantics<parallel>, #tpu.dimension_semantics<parallel>], iteration_bounds = array<i64: 2, 4>, scalar_prefetch = 0 : i64, scratch_operands = 0 : i64, tpu.core_type = #tpu.core_type<tc>, window_params = [{transform_indices = @transform_0, window_bounds = array<i64: 1, 4, 16, 4>}, {transform_indices = @transform_1, window_bounds = array<i64: 1, 1, 16, 4>}, {transform_indices = @transform_2, window_bounds = array<i64: 1, 1, 16, 4>}, {pipeline_mode = #tpu.pipeline_mode<synchronous>, transform_indices = @transform_3, window_bounds = array<i64: 4, 16>}, {pipeline_mode = #tpu.pipeline_mode<synchronous>, transform_indices = @transform_4, window_bounds = array<i64: 1, 16>}, {pipeline_mode = #tpu.pipeline_mode<synchronous>, transform_indices = @transform_5, window_bounds = array<i64: 1, 16>}, {pipeline_mode = #tpu.pipeline_mode<synchronous>, transform_indices = @transform_6, window_bounds = array<i64: 1, 16>}, {pipeline_mode = #tpu.pipeline_mode<synchronous>, transform_indices = @transform_7, window_bounds = array<i64: 9, 16>}, {pipeline_mode = #tpu.pipeline_mode<synchronous>, transform_indices = @transform_8, window_bounds = array<i64: 1, 16>}, {pipeline_mode = #tpu.pipeline_mode<synchronous>, transform_indices = @transform_9, window_bounds = array<i64: 16, 4>}, {pipeline_mode = #tpu.pipeline_mode<synchronous>, transform_indices = @transform_10, window_bounds = array<i64: 1, 4>}, {transform_indices = @transform_11, window_bounds = array<i64: 1, 4, 16, 4>}]} {
    %c0_i32 = arith.constant 0 : i32
    %0 = arith.cmpi sgt, %arg1, %c0_i32 : i32
    %1 = arith.extui %0 : i1 to i32
    %2 = arith.sitofp %1 : i32 to f32
    %c3_i32 = arith.constant 3 : i32
    %3 = arith.cmpi slt, %arg1, %c3_i32 : i32
    %4 = arith.extui %3 : i1 to i32
    %5 = arith.sitofp %4 : i32 to f32
    %c0 = arith.constant 0 : index
    %c0_0 = arith.constant 0 : index
    %c0_1 = arith.constant 0 : index
    %c0_2 = arith.constant 0 : index
    %6 = vector.load %arg2[%c0, %c0_0, %c0_1, %c0_2] : memref<1x4x16x4xf32, #tpu.memory_space<vmem>>, vector<1x4x16x4xf32>
    %7 = vector.shape_cast %6 : vector<1x4x16x4xf32> to vector<4x16x4xf32>
    %c0_3 = arith.constant 0 : index
    %c0_4 = arith.constant 0 : index
    %c0_5 = arith.constant 0 : index
    %c0_6 = arith.constant 0 : index
    %8 = vector.load %arg3[%c0_3, %c0_4, %c0_5, %c0_6] : memref<1x1x16x4xf32, #tpu.memory_space<vmem>>, vector<1x1x16x4xf32>
    %9 = vector.shape_cast %8 : vector<1x1x16x4xf32> to vector<1x16x4xf32>
    %c0_7 = arith.constant 0 : index
    %c0_8 = arith.constant 0 : index
    %c0_9 = arith.constant 0 : index
    %c0_10 = arith.constant 0 : index
    %10 = vector.load %arg4[%c0_7, %c0_8, %c0_9, %c0_10] : memref<1x1x16x4xf32, #tpu.memory_space<vmem>>, vector<1x1x16x4xf32>
    %11 = vector.shape_cast %10 : vector<1x1x16x4xf32> to vector<1x16x4xf32>
    %12 = tpu.concatenate %9, %7, %11 in 0 : vector<1x16x4xf32>, vector<4x16x4xf32>, vector<1x16x4xf32> -> vector<6x16x4xf32>
    %13 = vector.shape_cast %12 : vector<6x16x4xf32> to vector<96x4xf32>
    %c0_11 = arith.constant 0 : index
    %c0_12 = arith.constant 0 : index
    %14 = vector.load %arg5[%c0_11, %c0_12] : memref<4x16xf32, #tpu.memory_space<vmem>>, vector<4x16xf32>
    %cst = arith.constant dense<0.000000e+00> : vector<96x16xf32>
    %15 = tpu.matmul %13, %14, %cst {dimension_numbers = #tpu.dot_dimension_numbers<[1], [0], [0], [1], [0, 0, 1, 1], [], []>} : vector<96x4xf32>, vector<4x16xf32>, vector<96x16xf32> -> vector<96x16xf32>
    %c0_13 = arith.constant 0 : index
    %c0_14 = arith.constant 0 : index
    %16 = vector.load %arg6[%c0_13, %c0_14] : memref<1x16xf32, #tpu.memory_space<vmem>>, vector<1x16xf32>
    %17 = vector.shape_cast %16 : vector<1x16xf32> to vector<16xf32>
    %18 = vector.shape_cast %17 : vector<16xf32> to vector<1x16xf32>
    %19 = vector.broadcast %18 : vector<1x16xf32> to vector<96x16xf32>
    %20 = arith.addf %15, %19 : vector<96x16xf32>
    %cst_15 = arith.constant dense<0.000000e+00> : vector<96xf32>
    %21 = vector.multi_reduction <add>, %20, %cst_15 [1] : vector<96x16xf32> to vector<96xf32>
    %22 = vector.shape_cast %21 : vector<96xf32> to vector<96x1xf32>
    %cst_16 = arith.constant 1.600000e+01 : f32
    %23 = vector.broadcast %cst_16 : f32 to vector<96x1xf32>
    %24 = arith.divf %22, %23 : vector<96x1xf32>
    %25 = arith.mulf %20, %20 : vector<96x16xf32>
    %cst_17 = arith.constant dense<0.000000e+00> : vector<96xf32>
    %26 = vector.multi_reduction <add>, %25, %cst_17 [1] : vector<96x16xf32> to vector<96xf32>
    %27 = vector.shape_cast %26 : vector<96xf32> to vector<96x1xf32>
    %cst_18 = arith.constant 1.600000e+01 : f32
    %28 = vector.broadcast %cst_18 : f32 to vector<96x1xf32>
    %29 = arith.divf %27, %28 : vector<96x1xf32>
    %30 = arith.mulf %24, %24 : vector<96x1xf32>
    %31 = arith.subf %29, %30 : vector<96x1xf32>
    %cst_19 = arith.constant 9.99999997E-7 : f32
    %32 = vector.broadcast %cst_19 : f32 to vector<96x1xf32>
    %33 = arith.addf %31, %32 : vector<96x1xf32>
    %34 = math.rsqrt %33 : vector<96x1xf32>
    %35 = vector.broadcast %24 : vector<96x1xf32> to vector<96x16xf32>
    %36 = arith.subf %20, %35 : vector<96x16xf32>
    %37 = vector.broadcast %34 : vector<96x1xf32> to vector<96x16xf32>
    %38 = arith.mulf %36, %37 : vector<96x16xf32>
    %c0_20 = arith.constant 0 : index
    %c0_21 = arith.constant 0 : index
    %39 = vector.load %arg7[%c0_20, %c0_21] : memref<1x16xf32, #tpu.memory_space<vmem>>, vector<1x16xf32>
    %40 = vector.shape_cast %39 : vector<1x16xf32> to vector<16xf32>
    %41 = vector.shape_cast %40 : vector<16xf32> to vector<1x16xf32>
    %42 = vector.broadcast %41 : vector<1x16xf32> to vector<96x16xf32>
    %43 = arith.mulf %38, %42 : vector<96x16xf32>
    %c0_22 = arith.constant 0 : index
    %c0_23 = arith.constant 0 : index
    %44 = vector.load %arg8[%c0_22, %c0_23] : memref<1x16xf32, #tpu.memory_space<vmem>>, vector<1x16xf32>
    %45 = vector.shape_cast %44 : vector<1x16xf32> to vector<16xf32>
    %46 = vector.shape_cast %45 : vector<16xf32> to vector<1x16xf32>
    %47 = vector.broadcast %46 : vector<1x16xf32> to vector<96x16xf32>
    %48 = arith.addf %43, %47 : vector<96x16xf32>
    %49 = vector.shape_cast %48 : vector<96x16xf32> to vector<6x16x16xf32>
    %50 = vector.extract_strided_slice %49 {offsets = [0, 0, 0], sizes = [1, 16, 16], strides = [1, 1, 1]} : vector<6x16x16xf32> to vector<1x16x16xf32>
    %51 = vector.broadcast %2 : f32 to vector<1x16x16xf32>
    %52 = arith.mulf %50, %51 : vector<1x16x16xf32>
    %53 = vector.extract_strided_slice %49 {offsets = [1, 0, 0], sizes = [4, 16, 16], strides = [1, 1, 1]} : vector<6x16x16xf32> to vector<4x16x16xf32>
    %54 = vector.extract_strided_slice %49 {offsets = [5, 0, 0], sizes = [1, 16, 16], strides = [1, 1, 1]} : vector<6x16x16xf32> to vector<1x16x16xf32>
    %55 = vector.broadcast %5 : f32 to vector<1x16x16xf32>
    %56 = arith.mulf %54, %55 : vector<1x16x16xf32>
    %57 = tpu.concatenate %52, %53, %56 in 0 : vector<1x16x16xf32>, vector<4x16x16xf32>, vector<1x16x16xf32> -> vector<6x16x16xf32>
    %cst_24 = arith.constant 0.000000e+00 : f32
    %58 = vector.broadcast %cst_24 : f32 to vector<6x1x16xf32>
    %59 = vector.extract_strided_slice %57 {offsets = [0, 0, 0], sizes = [6, 15, 16], strides = [1, 1, 1]} : vector<6x16x16xf32> to vector<6x15x16xf32>
    %60 = tpu.concatenate %58, %59 in 1 : vector<6x1x16xf32>, vector<6x15x16xf32> -> vector<6x16x16xf32>
    %61 = vector.extract_strided_slice %57 {offsets = [0, 1, 0], sizes = [6, 15, 16], strides = [1, 1, 1]} : vector<6x16x16xf32> to vector<6x15x16xf32>
    %62 = tpu.concatenate %61, %58 in 1 : vector<6x15x16xf32>, vector<6x1x16xf32> -> vector<6x16x16xf32>
    %c0_25 = arith.constant 0 : index
    %c0_26 = arith.constant 0 : index
    %63 = vector.load %arg9[%c0_25, %c0_26] : memref<9x16xf32, #tpu.memory_space<vmem>>, vector<9x16xf32>
    %64 = vector.extract_strided_slice %57 {offsets = [1, 0, 0], sizes = [4, 16, 16], strides = [1, 1, 1]} : vector<6x16x16xf32> to vector<4x16x16xf32>
    %65 = vector.extract_strided_slice %63 {offsets = [4, 0], sizes = [1, 16], strides = [1, 1]} : vector<9x16xf32> to vector<1x16xf32>
    %66 = vector.shape_cast %65 : vector<1x16xf32> to vector<16xf32>
    %67 = vector.shape_cast %66 : vector<16xf32> to vector<1x1x16xf32>
    %68 = vector.broadcast %67 : vector<1x1x16xf32> to vector<4x16x16xf32>
    %69 = arith.mulf %64, %68 : vector<4x16x16xf32>
    %c0_27 = arith.constant 0 : index
    %c0_28 = arith.constant 0 : index
    %70 = vector.load %arg10[%c0_27, %c0_28] : memref<1x16xf32, #tpu.memory_space<vmem>>, vector<1x16xf32>
    %71 = vector.shape_cast %70 : vector<1x16xf32> to vector<16xf32>
    %72 = vector.shape_cast %71 : vector<16xf32> to vector<1x1x16xf32>
    %73 = vector.broadcast %72 : vector<1x1x16xf32> to vector<4x16x16xf32>
    %74 = arith.addf %69, %73 : vector<4x16x16xf32>
    %75 = vector.extract_strided_slice %60 {offsets = [0, 0, 0], sizes = [4, 16, 16], strides = [1, 1, 1]} : vector<6x16x16xf32> to vector<4x16x16xf32>
    %76 = vector.extract_strided_slice %63 {offsets = [0, 0], sizes = [1, 16], strides = [1, 1]} : vector<9x16xf32> to vector<1x16xf32>
    %77 = vector.shape_cast %76 : vector<1x16xf32> to vector<16xf32>
    %78 = vector.shape_cast %77 : vector<16xf32> to vector<1x1x16xf32>
    %79 = vector.broadcast %78 : vector<1x1x16xf32> to vector<4x16x16xf32>
    %80 = arith.mulf %75, %79 : vector<4x16x16xf32>
    %81 = arith.addf %74, %80 : vector<4x16x16xf32>
    %82 = vector.extract_strided_slice %57 {offsets = [0, 0, 0], sizes = [4, 16, 16], strides = [1, 1, 1]} : vector<6x16x16xf32> to vector<4x16x16xf32>
    %83 = vector.extract_strided_slice %63 {offsets = [1, 0], sizes = [1, 16], strides = [1, 1]} : vector<9x16xf32> to vector<1x16xf32>
    %84 = vector.shape_cast %83 : vector<1x16xf32> to vector<16xf32>
    %85 = vector.shape_cast %84 : vector<16xf32> to vector<1x1x16xf32>
    %86 = vector.broadcast %85 : vector<1x1x16xf32> to vector<4x16x16xf32>
    %87 = arith.mulf %82, %86 : vector<4x16x16xf32>
    %88 = arith.addf %81, %87 : vector<4x16x16xf32>
    %89 = vector.extract_strided_slice %62 {offsets = [0, 0, 0], sizes = [4, 16, 16], strides = [1, 1, 1]} : vector<6x16x16xf32> to vector<4x16x16xf32>
    %90 = vector.extract_strided_slice %63 {offsets = [2, 0], sizes = [1, 16], strides = [1, 1]} : vector<9x16xf32> to vector<1x16xf32>
    %91 = vector.shape_cast %90 : vector<1x16xf32> to vector<16xf32>
    %92 = vector.shape_cast %91 : vector<16xf32> to vector<1x1x16xf32>
    %93 = vector.broadcast %92 : vector<1x1x16xf32> to vector<4x16x16xf32>
    %94 = arith.mulf %89, %93 : vector<4x16x16xf32>
    %95 = arith.addf %88, %94 : vector<4x16x16xf32>
    %96 = vector.extract_strided_slice %60 {offsets = [1, 0, 0], sizes = [4, 16, 16], strides = [1, 1, 1]} : vector<6x16x16xf32> to vector<4x16x16xf32>
    %97 = vector.extract_strided_slice %63 {offsets = [3, 0], sizes = [1, 16], strides = [1, 1]} : vector<9x16xf32> to vector<1x16xf32>
    %98 = vector.shape_cast %97 : vector<1x16xf32> to vector<16xf32>
    %99 = vector.shape_cast %98 : vector<16xf32> to vector<1x1x16xf32>
    %100 = vector.broadcast %99 : vector<1x1x16xf32> to vector<4x16x16xf32>
    %101 = arith.mulf %96, %100 : vector<4x16x16xf32>
    %102 = arith.addf %95, %101 : vector<4x16x16xf32>
    %103 = vector.extract_strided_slice %62 {offsets = [1, 0, 0], sizes = [4, 16, 16], strides = [1, 1, 1]} : vector<6x16x16xf32> to vector<4x16x16xf32>
    %104 = vector.extract_strided_slice %63 {offsets = [5, 0], sizes = [1, 16], strides = [1, 1]} : vector<9x16xf32> to vector<1x16xf32>
    %105 = vector.shape_cast %104 : vector<1x16xf32> to vector<16xf32>
    %106 = vector.shape_cast %105 : vector<16xf32> to vector<1x1x16xf32>
    %107 = vector.broadcast %106 : vector<1x1x16xf32> to vector<4x16x16xf32>
    %108 = arith.mulf %103, %107 : vector<4x16x16xf32>
    %109 = arith.addf %102, %108 : vector<4x16x16xf32>
    %110 = vector.extract_strided_slice %60 {offsets = [2, 0, 0], sizes = [4, 16, 16], strides = [1, 1, 1]} : vector<6x16x16xf32> to vector<4x16x16xf32>
    %111 = vector.extract_strided_slice %63 {offsets = [6, 0], sizes = [1, 16], strides = [1, 1]} : vector<9x16xf32> to vector<1x16xf32>
    %112 = vector.shape_cast %111 : vector<1x16xf32> to vector<16xf32>
    %113 = vector.shape_cast %112 : vector<16xf32> to vector<1x1x16xf32>
    %114 = vector.broadcast %113 : vector<1x1x16xf32> to vector<4x16x16xf32>
    %115 = arith.mulf %110, %114 : vector<4x16x16xf32>
    %116 = arith.addf %109, %115 : vector<4x16x16xf32>
    %117 = vector.extract_strided_slice %57 {offsets = [2, 0, 0], sizes = [4, 16, 16], strides = [1, 1, 1]} : vector<6x16x16xf32> to vector<4x16x16xf32>
    %118 = vector.extract_strided_slice %63 {offsets = [7, 0], sizes = [1, 16], strides = [1, 1]} : vector<9x16xf32> to vector<1x16xf32>
    %119 = vector.shape_cast %118 : vector<1x16xf32> to vector<16xf32>
    %120 = vector.shape_cast %119 : vector<16xf32> to vector<1x1x16xf32>
    %121 = vector.broadcast %120 : vector<1x1x16xf32> to vector<4x16x16xf32>
    %122 = arith.mulf %117, %121 : vector<4x16x16xf32>
    %123 = arith.addf %116, %122 : vector<4x16x16xf32>
    %124 = vector.extract_strided_slice %62 {offsets = [2, 0, 0], sizes = [4, 16, 16], strides = [1, 1, 1]} : vector<6x16x16xf32> to vector<4x16x16xf32>
    %125 = vector.extract_strided_slice %63 {offsets = [8, 0], sizes = [1, 16], strides = [1, 1]} : vector<9x16xf32> to vector<1x16xf32>
    %126 = vector.shape_cast %125 : vector<1x16xf32> to vector<16xf32>
    %127 = vector.shape_cast %126 : vector<16xf32> to vector<1x1x16xf32>
    %128 = vector.broadcast %127 : vector<1x1x16xf32> to vector<4x16x16xf32>
    %129 = arith.mulf %124, %128 : vector<4x16x16xf32>
    %130 = arith.addf %123, %129 : vector<4x16x16xf32>
    %131 = math.absf %130 : vector<4x16x16xf32>
    %cst_29 = arith.constant 0.707106769 : f32
    %132 = vector.broadcast %cst_29 : f32 to vector<4x16x16xf32>
    %133 = arith.mulf %131, %132 : vector<4x16x16xf32>
    %cst_30 = arith.constant 0.327591091 : f32
    %134 = vector.broadcast %cst_30 : f32 to vector<4x16x16xf32>
    %135 = arith.mulf %134, %133 : vector<4x16x16xf32>
    %cst_31 = arith.constant 1.000000e+00 : f32
    %136 = vector.broadcast %cst_31 : f32 to vector<4x16x16xf32>
    %137 = arith.addf %136, %135 : vector<4x16x16xf32>
    %cst_32 = arith.constant 1.000000e+00 : f32
    %138 = vector.broadcast %cst_32 : f32 to vector<4x16x16xf32>
    %139 = arith.divf %138, %137 : vector<4x16x16xf32>
    %cst_33 = arith.constant 1.06140542 : f32
    %140 = vector.broadcast %cst_33 : f32 to vector<4x16x16xf32>
    %141 = arith.mulf %140, %139 : vector<4x16x16xf32>
    %cst_34 = arith.constant -1.45315206 : f32
    %142 = vector.broadcast %cst_34 : f32 to vector<4x16x16xf32>
    %143 = arith.addf %141, %142 : vector<4x16x16xf32>
    %144 = arith.mulf %143, %139 : vector<4x16x16xf32>
    %cst_35 = arith.constant 1.42141378 : f32
    %145 = vector.broadcast %cst_35 : f32 to vector<4x16x16xf32>
    %146 = arith.addf %144, %145 : vector<4x16x16xf32>
    %147 = arith.mulf %146, %139 : vector<4x16x16xf32>
    %cst_36 = arith.constant -0.284496725 : f32
    %148 = vector.broadcast %cst_36 : f32 to vector<4x16x16xf32>
    %149 = arith.addf %147, %148 : vector<4x16x16xf32>
    %150 = arith.mulf %149, %139 : vector<4x16x16xf32>
    %cst_37 = arith.constant 0.254829586 : f32
    %151 = vector.broadcast %cst_37 : f32 to vector<4x16x16xf32>
    %152 = arith.addf %150, %151 : vector<4x16x16xf32>
    %153 = arith.mulf %152, %139 : vector<4x16x16xf32>
    %cst_38 = arith.constant 5.000000e-01 : f32
    %154 = vector.broadcast %cst_38 : f32 to vector<4x16x16xf32>
    %155 = arith.mulf %154, %153 : vector<4x16x16xf32>
    %cst_39 = arith.constant 0.000000e+00 : f32
    %156 = vector.broadcast %cst_39 : f32 to vector<4x16x16xf32>
    %157 = arith.subf %156, %133 : vector<4x16x16xf32>
    %158 = arith.mulf %157, %133 : vector<4x16x16xf32>
    %159 = math.exp %158 : vector<4x16x16xf32>
    %160 = arith.mulf %155, %159 : vector<4x16x16xf32>
    %cst_40 = arith.constant 0.000000e+00 : f32
    %161 = vector.broadcast %cst_40 : f32 to vector<4x16x16xf32>
    %162 = arith.cmpf oge, %130, %161 : vector<4x16x16xf32>
    %cst_41 = arith.constant 1.000000e+00 : f32
    %163 = vector.broadcast %cst_41 : f32 to vector<4x16x16xf32>
    %164 = arith.subf %163, %160 : vector<4x16x16xf32>
    %165 = arith.select %162, %164, %160 : vector<4x16x16xi1>, vector<4x16x16xf32>
    %166 = arith.mulf %130, %165 : vector<4x16x16xf32>
    %167 = vector.shape_cast %166 : vector<4x16x16xf32> to vector<64x16xf32>
    %c0_42 = arith.constant 0 : index
    %c0_43 = arith.constant 0 : index
    %168 = vector.load %arg11[%c0_42, %c0_43] : memref<16x4xf32, #tpu.memory_space<vmem>>, vector<16x4xf32>
    %cst_44 = arith.constant dense<0.000000e+00> : vector<64x4xf32>
    %169 = tpu.matmul %167, %168, %cst_44 {dimension_numbers = #tpu.dot_dimension_numbers<[1], [0], [0], [1], [0, 0, 1, 1], [], []>} : vector<64x16xf32>, vector<16x4xf32>, vector<64x4xf32> -> vector<64x4xf32>
    %c0_45 = arith.constant 0 : index
    %c0_46 = arith.constant 0 : index
    %170 = vector.load %arg12[%c0_45, %c0_46] : memref<1x4xf32, #tpu.memory_space<vmem>>, vector<1x4xf32>
    %171 = vector.shape_cast %170 : vector<1x4xf32> to vector<4xf32>
    %172 = vector.shape_cast %171 : vector<4xf32> to vector<1x4xf32>
    %173 = vector.broadcast %172 : vector<1x4xf32> to vector<64x4xf32>
    %174 = arith.addf %169, %173 : vector<64x4xf32>
    %175 = vector.shape_cast %174 : vector<64x4xf32> to vector<4x16x4xf32>
    %176 = arith.addf %7, %175 : vector<4x16x4xf32>
    %c0_47 = arith.constant 0 : index
    %c0_48 = arith.constant 0 : index
    %c0_49 = arith.constant 0 : index
    %c0_50 = arith.constant 0 : index
    %177 = vector.load %arg13[%c0_47, %c0_48, %c0_49, %c0_50] : memref<1x4x16x4xf32, #tpu.memory_space<vmem>>, vector<1x4x16x4xf32>
    %178 = vector.shape_cast %177 : vector<1x4x16x4xf32> to vector<4x16x4xf32>
    %179 = vector.shape_cast %176 : vector<4x16x4xf32> to vector<1x4x16x4xf32>
    tpu.vector_store %arg13[%c0_47, %c0_48, %c0_49, %c0_50], %179 {strides = array<i32>} : memref<1x4x16x4xf32, #tpu.memory_space<vmem>>, vector<1x4x16x4xf32>,
    return
  }
  func.func @transform_0(%arg0: i32, %arg1: i32) -> (i32, i32, i32, i32) {
    %c0_i32 = arith.constant 0 : i32
    %c0_i32_0 = arith.constant 0 : i32
    %c0_i32_1 = arith.constant 0 : i32
    return %arg0, %arg1, %c0_i32, %c0_i32_0 : i32, i32, i32, i32
  }
  func.func @transform_1(%arg0: i32, %arg1: i32) -> (i32, i32, i32, i32) {
    %c4_i32 = arith.constant 4 : i32
    %0 = arith.muli %arg1, %c4_i32 : i32
    %c1_i32 = arith.constant 1 : i32
    %1 = arith.subi %0, %c1_i32 : i32
    %c0_i32 = arith.constant 0 : i32
    %2 = arith.maxsi %1, %c0_i32 : i32
    %c0_i32_0 = arith.constant 0 : i32
    %c0_i32_1 = arith.constant 0 : i32
    %c0_i32_2 = arith.constant 0 : i32
    return %arg0, %2, %c0_i32_0, %c0_i32_1 : i32, i32, i32, i32
  }
  func.func @transform_2(%arg0: i32, %arg1: i32) -> (i32, i32, i32, i32) {
    %c1_i32 = arith.constant 1 : i32
    %0 = arith.addi %arg1, %c1_i32 : i32
    %c4_i32 = arith.constant 4 : i32
    %1 = arith.muli %0, %c4_i32 : i32
    %c15_i32 = arith.constant 15 : i32
    %2 = arith.minsi %1, %c15_i32 : i32
    %c0_i32 = arith.constant 0 : i32
    %c0_i32_0 = arith.constant 0 : i32
    %c0_i32_1 = arith.constant 0 : i32
    return %arg0, %2, %c0_i32, %c0_i32_0 : i32, i32, i32, i32
  }
  func.func @transform_3(%arg0: i32, %arg1: i32) -> (i32, i32) {
    %c0_i32 = arith.constant 0 : i32
    %c0_i32_0 = arith.constant 0 : i32
    %c0_i32_1 = arith.constant 0 : i32
    return %c0_i32, %c0_i32_0 : i32, i32
  }
  func.func @transform_4(%arg0: i32, %arg1: i32) -> (i32, i32) {
    %c0_i32 = arith.constant 0 : i32
    %c0_i32_0 = arith.constant 0 : i32
    %c0_i32_1 = arith.constant 0 : i32
    return %c0_i32, %c0_i32_0 : i32, i32
  }
  func.func @transform_5(%arg0: i32, %arg1: i32) -> (i32, i32) {
    %c0_i32 = arith.constant 0 : i32
    %c0_i32_0 = arith.constant 0 : i32
    %c0_i32_1 = arith.constant 0 : i32
    return %c0_i32, %c0_i32_0 : i32, i32
  }
  func.func @transform_6(%arg0: i32, %arg1: i32) -> (i32, i32) {
    %c0_i32 = arith.constant 0 : i32
    %c0_i32_0 = arith.constant 0 : i32
    %c0_i32_1 = arith.constant 0 : i32
    return %c0_i32, %c0_i32_0 : i32, i32
  }
  func.func @transform_7(%arg0: i32, %arg1: i32) -> (i32, i32) {
    %c0_i32 = arith.constant 0 : i32
    %c0_i32_0 = arith.constant 0 : i32
    %c0_i32_1 = arith.constant 0 : i32
    return %c0_i32, %c0_i32_0 : i32, i32
  }
  func.func @transform_8(%arg0: i32, %arg1: i32) -> (i32, i32) {
    %c0_i32 = arith.constant 0 : i32
    %c0_i32_0 = arith.constant 0 : i32
    %c0_i32_1 = arith.constant 0 : i32
    return %c0_i32, %c0_i32_0 : i32, i32
  }
  func.func @transform_9(%arg0: i32, %arg1: i32) -> (i32, i32) {
    %c0_i32 = arith.constant 0 : i32
    %c0_i32_0 = arith.constant 0 : i32
    %c0_i32_1 = arith.constant 0 : i32
    return %c0_i32, %c0_i32_0 : i32, i32
  }
  func.func @transform_10(%arg0: i32, %arg1: i32) -> (i32, i32) {
    %c0_i32 = arith.constant 0 : i32
    %c0_i32_0 = arith.constant 0 : i32
    %c0_i32_1 = arith.constant 0 : i32
    return %c0_i32, %c0_i32_0 : i32, i32
  }
  func.func @transform_11(%arg0: i32, %arg1: i32) -> (i32, i32, i32, i32) {
    %c0_i32 = arith.constant 0 : i32
    %c0_i32_0 = arith.constant 0 : i32
    %c0_i32_1 = arith.constant 0 : i32
    return %arg0, %arg1, %c0_i32, %c0_i32_0 : i32, i32, i32, i32
  }
}

</mosaic_0001>

<bundles_post_ra>
// kernel: tpu_custom_call.1
= control target key start
LH: loop header
LB: loop body
LE: loop exit
PB: predicated region body
PF: predicated region fallthrough
CT: control target
= control target key end

     0   :  { %s2081_s17 = smov 0   ;;  %s2083_s18 = smov 0   ;;  %s2809_s0 = inlined_call_operand.vmem [shape: f32[2,16,16,4], index: 0, kind: input, shape index: {}]   ;;  %s2810_s1 = inlined_call_operand.vmem [shape: f32[2,16,16,4], index: 1, kind: input, shape index: {}]   ;;  %s2811_s2 = inlined_call_operand.vmem [shape: f32[2,16,16,4], index: 2, kind: input, shape index: {}]   ;;  %s2812_s3 = inlined_call_operand.vmem [shape: f32[4,16], index: 3, kind: input, shape index: {}]   ;;  %s2813_s4 = inlined_call_operand.vmem [shape: f32[1,16], index: 4, kind: input, shape index: {}]   ;;  %s2814_s5 = inlined_call_operand.vmem [shape: f32[1,16], index: 5, kind: input, shape index: {}]   ;;  %s2815_s6 = inlined_call_operand.vmem [shape: f32[1,16], index: 6, kind: input, shape index: {}]   ;;  %s2816_s7 = inlined_call_operand.vmem [shape: f32[9,16], index: 7, kind: input, shape index: {}]   ;;  %s2817_s8 = inlined_call_operand.vmem [shape: f32[1,16], index: 8, kind: input, shape index: {}]   ;;  %s2818_s9 = inlined_call_operand.vmem [shape: f32[16,4], index: 9, kind: input, shape index: {}]   ;;  %s2819_s10 = inlined_call_operand.vmem [shape: f32[1,4], index: 10, kind: input, shape index: {}]   ;;  %s2820_s11 = inlined_call_operand.vmem [shape: f32[2,16,16,4], index: 11, kind: output, shape index: {}]  }
   0x1   :  { %2822 = sst [smem:[#allocation5_spill]] %s2812_s3  ;;  %s2085_s19 = smov 0  }
   0x2   :  { %s2087_s20 = smov 0   ;;  %s2089_s21 = smov 0  }
   0x3 LB: > { %2823 = sst [smem:[#allocation2_spill]] %s2015_s20  ;;  %s30_s22 = sadd.s32 1, %s2011_s19  ;;  %s2019_s21 = sphi %s2089_s21, %s21_s21   ;;  %s2015_s20 = sphi %s2087_s20, %s2829_s20   ;;  %s2011_s19 = sphi %s2085_s19, %s2831_s19   ;;  %s2007_s18 = sphi %s2083_s18, %s2827_s18   ;;  %s2003_s17 = sphi %s2081_s17, %s2830_s17  }
   0x4   : > { %s33_s23 = sadd.s32 1, %s2015_s20  ;;  %p31_p0 = scmp.ge.s32.totalorder %s30_s22, 4 }
   0x5   : > { %p1753_p1 = scmp.ge.s32.totalorder %s2019_s21, 1  ;;  %p423_p2 = scmp.lt.s32.totalorder %s2019_s21, 9 }
   0x6   : > { %s2833_s22 = smov (%p31_p0, %s30_s22), 0  ;;  %s2835_s23 = smov (!%p31_p0, %s33_s23), %s2015_s20 }
   0x7   : > { %2824 = sst [smem:[#allocation3_spill]] %s2833_s22  ;;  %p424_p3 = pnand %p1753_p1, %p423_p2 }
   0x8   : > { %p35_p4 = scmp.ge.s32.totalorder %s2835_s23, 2  ;;  %s2826_s3 = sld [smem:[#allocation5_spill]] (!%p424_p3) }
   0x9   : > { %427 = sbr.rel (%p424_p3) target bundleno = 732 (0x2dc), region = 64  ;;  %s1754_s26 = sshll.u32 (!%p424_p3), %s2003_s17, 2 }
   0xa   : > { %s2837_s23 = smov (%p35_p4, %s2835_s23), 0  ;;  %p500_p5 = scmp.lt.s32.totalorder (!%p424_p3), %s2007_s18, 1 }
   0xb   : > { %2825 = sst [smem:[#allocation4_spill]] %s2837_s23  ;;  %p502_p6 = scmp.lt.s32.totalorder (!%p424_p3), %s1754_s26, 15 }
   0xc   : > { %s1759_s27 = sadd.s32 (!%p424_p3), 4294967295, %s1754_s26  ;;  %s1815_s13 = sadd.s32 (!%p424_p3), 4, %s1754_s26 }
   0xd   : > { %p512_p7 = scmp.gt.s32.totalorder (!%p424_p3), %s1759_s27, 0  ;;  %p1760_p8 = scmp.lt.s32.totalorder (!%p424_p3), %s1759_s27, 15 }
   0xe   : > { %v573_v0 = vld [vmem:[%s2826_s3] sm:$0xf]  ;;  %vm618_vm0 = vcmask 1043456   ;;  %s2839_s18 = smov (!%p500_p5, %s2007_s18), 1  ;;  %p529_p9 = scmp.lt.s32.totalorder %s1815_s13, 15  ;;  %vm581_vm1 = vcmask 31744  }
   0xf   : > { %1839 = vmatprep.subr.msk.mxu0 %vm618_vm0, %v573_v0  ;;  %1875 = vmatprep.subr.msk.mxu1 %vm618_vm0, %v573_v0  ;;  %s503_s28 = scalar_select %p502_p6, %s1754_s26, 15  ;;  %v2156_v13 = vld [vmem:[%s2813_s4] ss:$0 sm:$0xff]  ;;  %vm747_vm2 = vcmask 130048   ;;  %vm985_vm3 = vcmask 1040384   ;;  %vm1022_vm4 = vcmask 1046528  }
  0x10   : > { %1840 = vmatpush3.msk.msra.mxu0 %vm618_vm0, %v573_v0  ;;  %1876 = vmatpush3.msk.msra.mxu1 %vm618_vm0, %v573_v0  ;;  %s1756_s29 = sshll.u32 %s2839_s18, 5  ;;  %s2841_s27 = smov (!%p512_p7, %s1759_s27), 0 }
  0x11   : > { %s1755_s30 = sshll.u32 %s503_s28, 1  ;;  %s2843_s13 = smov (!%p529_p9, %s1815_s13), 15 }
  0x12   : > { %s2117_s12 = sadd.s32 %s1756_s29, %s1755_s30  ;;  %s2845_s27 = smov (!%p1760_p8, %s2841_s27), 15 }
  0x13   : > { %s1757_s14 = sshll.u32 %s2117_s12, 3  ;;  %s2847_s13 = smov (!%p529_p9, %s2843_s13), 15 }
  0x14   : > { %s2125_s24 = scalar_lea.vmem %s2809_s0, %s1757_s14  ;;  %s1765_s18 = sshll.u32 %s2845_s27, 1 }
  0x15   : > { %s520_s25 = sadd.s32 %s1765_s18, %s1756_s29  ;;  %s1772_s28 = sshll.u32 %s2847_s13, 1  ;;  %v561_v3 = vld [vmem:[%s2125_s24] sm:$0xff]  ;;  %v562_v6 = vld [vmem:[%s2125_s24 + $0x8] sm:$0xff]  ;;  %v563_v7 = vld [vmem:[%s2125_s24 + $0x10] sm:$0xff] }
  0x16   : > { %s1767_s30 = sshll.u32 %s520_s25, 3  ;;  %s537_s26 = sadd.s32 %s1772_s28, %s1756_s29  ;;  %v564_v8 = vld [vmem:[%s2125_s24 + $0x18] sm:$0xff]  ;;  %v565_v9 = vld [vmem:[%s2125_s24 + $0x20] sm:$0xff]  ;;  %v566_v10 = vld [vmem:[%s2125_s24 + $0x28] sm:$0xff] }
  0x17   : > { %s522_s22 = scalar_lea.vmem %s2810_s1, %s1767_s30  ;;  %s1774_s20 = sshll.u32 %s537_s26, 3  ;;  %v567_v11 = vld [vmem:[%s2125_s24 + $0x30] sm:$0xff]  ;;  %v568_v12 = vld [vmem:[%s2125_s24 + $0x38] sm:$0xff] }
  0x18   : > { %v569_v1 = vld [vmem:[%s522_s22] sm:$0xff]  ;;  %v570_v2 = vld [vmem:[%s522_s22 + $0x8] sm:$0xff]  ;;  %s539_s27 = scalar_lea.vmem %s2811_s2, %s1774_s20  ;;  %p555_p10 = scmp.gt.s32.totalorder %s2003_s17, 0 }
  0x19   : > { %1841 = vmatprep.mubr.msk.f32.mxu0 %vm581_vm1, %v569_v1  ;;  %v571_v4 = vld [vmem:[%s539_s27] sm:$0xff]  ;;  %v572_v5 = vld [vmem:[%s539_s27 + $0x8] sm:$0xff]  ;;  %p558_p11 = scmp.lt.s32.totalorder %s2003_s17, 3  ;;  %s2768_s30 = scalar_lea.vmem %s2820_s11, %s1757_s14 }
  0x1a   : > { %1842 = vmatmul.mubr.msk.f32.vlgmr.msra.gmra.mxu0 %vm581_vm1, %v570_v2  ;;  %1856 = vmatprep.mubr.msk.f32.mxu1 %vm581_vm1, %v571_v4  ;;  %s2277_s18 = scalar_select %p555_p10, 1, 0 }
  0x1b   : > { %1844 = vmatprep.mubr.msk.f32.mxu0 %vm581_vm1, %v561_v3  ;;  %1857 = vmatmul.mubr.msk.f32.vlgmr.msra.gmra.mxu1 %vm581_vm1, %v572_v5  ;;  %s2319_s3 = scalar_select %p558_p11, 1, 0 }
  0x1c   : > { %s557_s25 = scvt.s32.f32 %s2277_s18 }
  0x1d   : > { %s560_s17 = scvt.s32.f32 %s2319_s3 }
  0x1e   : > { %1845 = vmatmul.mubr.msk.f32.gmra.mxu0 %vm581_vm1, %v562_v6 }
  0x1f   : > { %1847 = vmatprep.mubr.msk.f32.mxu0 %vm581_vm1, %v563_v7 }
  0x22   : > { %1848 = vmatmul.mubr.msk.f32.gmra.mxu0 %vm581_vm1, %v564_v8 }
  0x23   : > { %1850 = vmatprep.mubr.msk.f32.mxu0 %vm581_vm1, %v565_v9 }
  0x26   : > { %1851 = vmatmul.mubr.msk.f32.gmra.mxu0 %vm581_vm1, %v566_v10  ;;  %v1449_v10 = vld [vmem:[%s2818_s9 + $0x8] sm:$0xff] }
  0x27   : > { %1853 = vmatprep.mubr.msk.f32.mxu0 %vm581_vm1, %v567_v11  ;;  %v1448_v11 = vld [vmem:[%s2818_s9] sm:$0xff]  ;;  %1859 = vmatprep.subr.mxu1 %v1449_v10 }
  0x28   : > { %1860 = vmatpush3.msra.mxu1 %v1449_v10 }
  0x29   : > { %1861 = vmatprep.subr.mxu1 %v1448_v11 }
  0x2a   : > { %1854 = vmatmul.mubr.msk.f32.gmra.mxu0 %vm581_vm1, %v568_v12  ;;  %1862 = vmatpush3.msra.mxu1 %v1448_v11  ;;  %v2303_v11 = vld [vmem:[%s2815_s6] ss:$0 sm:$0xff] }
  0xda   : > { %v1843_v14 = vpop.f32.mrf.mxu0 }
  0xdb   : > { %v2159_v15 = vadd.f32 %v1843_v14, %v2156_v13  ;;  %v1858_v54 = vpop.f32.mrf.mxu1 }
  0xdc   : > { %v688_v16 = vpop.f32.mrf.mxu0  ;;  %v2245_v4 = vadd.f32 %v1858_v54, %v2156_v13 }
  0xdd   : > { %v2162_v17 = vadd.f32 %v2156_v13, %v688_v16  ;;  %v751_v18 = vsel %vm747_vm2, %v2159_v15, 0.0  ;;  %v798_v26 = vmul.f32 %v2159_v15, %v2159_v15  ;;  %v738_v59 = vpop.f32.mrf.mxu1 }
  0xde   : > { %752 = vadd.xlane.f32.xlu0 %v751_v18  ;;  %v1846_v19 = vpop.f32.mrf.mxu0  ;;  %v2233_v62 = vadd.f32 %v2156_v13, %v738_v59  ;;  %v781_v7 = vsel %vm747_vm2, %v2245_v4, 0.0  ;;  %v808_v8 = vmul.f32 %v2245_v4, %v2245_v4 }
  0xdf   : > { %v2167_v20 = vadd.f32 %v1846_v19, %v2156_v13  ;;  %v797_v21 = vmul.f32 %v2162_v17, %v2162_v17  ;;  %v748_v24 = vsel %vm747_vm2, %v2162_v17, 0.0  ;;  %v812_v30 = vsel %vm747_vm2, %v798_v26, 0.0 }
  0xe0   : > { %v698_v22 = vpop.f32.mrf.mxu0  ;;  %v778_v2 = vsel %vm747_vm2, %v2233_v62, 0.0  ;;  %v807_v3 = vmul.f32 %v2233_v62, %v2233_v62  ;;  %v842_v9 = vsel %vm747_vm2, %v808_v8, 0.0 }
  0xe1   : > { %v809_v23 = vsel %vm747_vm2, %v797_v21, 0.0  ;;  %v2175_v25 = vadd.f32 %v2156_v13, %v698_v22  ;;  %v757_v28 = vsel %vm747_vm2, %v2167_v20, 0.0  ;;  %v800_v36 = vmul.f32 %v2167_v20, %v2167_v20 }
  0xe2   : > { %810 = vadd.xlane.f32.xlu1 %v809_v23  ;;  %749 = vadd.xlane.f32.xlu0 %v748_v24  ;;  %v1849_v27 = vpop.f32.mrf.mxu0  ;;  %v839_v6 = vsel %vm747_vm2, %v807_v3, 0.0 }
  0xe3   : > { %v799_v31 = vmul.f32 %v2175_v25, %v2175_v25  ;;  %v754_v35 = vsel %vm747_vm2, %v2175_v25, 0.0  ;;  %v2197_v40 = vadd.f32 %v1849_v27, %v2156_v13  ;;  %v818_v41 = vsel %vm747_vm2, %v800_v36, 0.0 }
  0xe4   : > { %v708_v29 = vpop.f32.mrf.mxu0 }
  0xe5   : > { %v2185_v32 = vadd.f32 %v2156_v13, %v708_v29  ;;  %v815_v34 = vsel %vm747_vm2, %v799_v31, 0.0  ;;  %v763_v45 = vsel %vm747_vm2, %v2197_v40, 0.0  ;;  %v802_v46 = vmul.f32 %v2197_v40, %v2197_v40 }
  0xe6   : > { %813 = vadd.xlane.f32.xlu0 %v812_v30  ;;  %758 = vadd.xlane.f32.xlu1 %v757_v28  ;;  %v1852_v33 = vpop.f32.mrf.mxu0 }
  0xe7   : > { %v760_v37 = vsel %vm747_vm2, %v2185_v32, 0.0  ;;  %v801_v38 = vmul.f32 %v2185_v32, %v2185_v32  ;;  %v2213_v50 = vadd.f32 %v1852_v33, %v2156_v13  ;;  %v824_v51 = vsel %vm747_vm2, %v802_v46, 0.0 }
  0xe8   : > { %v718_v39 = vpop.f32.mrf.mxu0 }
  0xe9   : > { %v2201_v42 = vadd.f32 %v2156_v13, %v718_v39  ;;  %v821_v43 = vsel %vm747_vm2, %v801_v38, 0.0  ;;  %v769_v55 = vsel %vm747_vm2, %v2213_v50, 0.0  ;;  %v804_v56 = vmul.f32 %v2213_v50, %v2213_v50 }
  0xea   : > { %816 = vadd.xlane.f32.xlu0 %v815_v34  ;;  %755 = vadd.xlane.f32.xlu1 %v754_v35  ;;  %v1855_v44 = vpop.f32.mrf.mxu0 }
  0xeb   : > { %v766_v47 = vsel %vm747_vm2, %v2201_v42, 0.0  ;;  %v803_v48 = vmul.f32 %v2201_v42, %v2201_v42  ;;  %v2229_v60 = vadd.f32 %v1855_v44, %v2156_v13  ;;  %v830_v61 = vsel %vm747_vm2, %v804_v56, 0.0 }
  0xec   : > { %v728_v49 = vpop.f32.mrf.mxu0 }
  0xed   : > { %v2217_v52 = vadd.f32 %v2156_v13, %v728_v49  ;;  %v827_v53 = vsel %vm747_vm2, %v803_v48, 0.0  ;;  %v775_v0 = vsel %vm747_vm2, %v2229_v60, 0.0  ;;  %v806_v1 = vmul.f32 %v2229_v60, %v2229_v60 }
  0xee   : > { %761 = vadd.xlane.f32.xlu0 %v760_v37  ;;  %819 = vadd.xlane.f32.xlu1 %v818_v41  ;;  %v1061_v49 = vlaneseq }
  0xef   : > { %v772_v57 = vsel %vm747_vm2, %v2217_v52, 0.0  ;;  %v805_v58 = vmul.f32 %v2217_v52, %v2217_v52  ;;  %v836_v5 = vsel %vm747_vm2, %v806_v1, 0.0 }
  0xf1   : > { %v833_v63 = vsel %vm747_vm2, %v805_v58, 0.0  ;;  %v2281_v58 = vshrl.u32 %v1061_v49, 7 }
  0xf2   : > { %822 = vadd.xlane.f32.xlu0 %v821_v43  ;;  %764 = vadd.xlane.f32.xlu1 %v763_v45 }
  0xf6   : > { %767 = vadd.xlane.f32.xlu0 %v766_v47  ;;  %825 = vadd.xlane.f32.xlu1 %v824_v51 }
  0xfa   : > { %828 = vadd.xlane.f32.xlu0 %v827_v53  ;;  %770 = vadd.xlane.f32.xlu1 %v769_v55 }
  0xfe   : > { %773 = vadd.xlane.f32.xlu0 %v772_v57  ;;  %831 = vadd.xlane.f32.xlu1 %v830_v61 }
 0x102   : > { %834 = vadd.xlane.f32.xlu0 %v833_v63  ;;  %776 = vadd.xlane.f32.xlu1 %v775_v0 }
 0x106   : > { %779 = vadd.xlane.f32.xlu0 %v778_v2  ;;  %837 = vadd.xlane.f32.xlu1 %v836_v5  ;;  %v2290_v5 = vld [vmem:[%s2814_s5] ss:$0 sm:$0xff] }
 0x10a   : > { %840 = vadd.xlane.f32.xlu0 %v839_v6  ;;  %782 = vadd.xlane.f32.xlu1 %v781_v7  ;;  %v1090_v6 = vsub.s32 0, %v2281_v58 }
 0x10e   : > { %843 = vadd.xlane.f32.xlu1 %v842_v9 }
 0x167   : > { %v753_v12 = vpop.xlane.xlu0 %752 }
 0x168   : > { %v2260_v16 = vmul.f32 0.0625, %v753_v12  ;;  %v1110_v12 = vsub.s32 1, %v2281_v58 }
 0x16a   : > { %v858_v24 = vmul.f32 %v2260_v16, %v2260_v16  ;;  %v906_v8 = vsub.f32 %v2159_v15, %v2260_v16  ;;  %v1059_v15 = vld [vmem:[%s2816_s7] sm:$0xff] }
 0x16b   : > { %v811_v13 = vpop.xlane.xlu1 %810  ;;  %v750_v14 = vpop.xlane.xlu0 %749 }
 0x16c   : > { %v785_v18 = vmul.f32 0.0625, %v750_v14  ;;  %v845_v19 = vmul.f32 0.0625, %v811_v13 }
 0x16e   : > { %v857_v21 = vmul.f32 %v785_v18, %v785_v18  ;;  %v905_v63 = vsub.f32 %v2162_v17, %v785_v18 }
 0x16f   : > { %v814_v22 = vpop.xlane.xlu0 %813  ;;  %v759_v23 = vpop.xlane.xlu1 %758 }
 0x170   : > { %v869_v26 = vsub.f32 %v845_v19, %v857_v21  ;;  %v846_v27 = vmul.f32 0.0625, %v814_v22  ;;  %v2264_v34 = vmul.f32 0.0625, %v759_v23  ;;  %v967_v19 = vstv %s557_s25 }
 0x171   : > { %v2310_v23 = vrot.slane %v1059_v15, %v1090_v6 }
 0x172   : > { %v881_v28 = vadd.f32 1e-06, %v869_v26  ;;  %v870_v29 = vsub.f32 %v846_v27, %v858_v24  ;;  %v860_v41 = vmul.f32 %v2264_v34, %v2264_v34  ;;  %v1063_v24 = vsub.s32 4, %v2281_v58 }
 0x173   : > { %v817_v30 = vpop.xlane.xlu0 %816  ;;  %v756_v31 = vpop.xlane.xlu1 %755  ;;  %v1150_v26 = vsub.s32 3, %v2281_v58 }
 0x174   : > { %1917 = vrsqrt.f32 %v881_v28  ;;  %v882_v33 = vadd.f32 1e-06, %v870_v29  ;;  %v2266_v35 = vmul.f32 0.0625, %v756_v31  ;;  %v847_v36 = vmul.f32 0.0625, %v817_v30 }
 0x175   : > { %v1130_v31 = vsub.s32 2, %v2281_v58 }
 0x176   : > { %1919 = vrsqrt.f32 %v882_v33  ;;  %v859_v37 = vmul.f32 %v2266_v35, %v2266_v35 }
 0x177   : > { %v762_v38 = vpop.xlane.xlu0 %761  ;;  %v820_v39 = vpop.xlane.xlu1 %819 }
 0x178   : > { %v871_v43 = vsub.f32 %v847_v36, %v859_v37  ;;  %v2273_v44 = vmul.f32 0.0625, %v762_v38  ;;  %v848_v45 = vmul.f32 0.0625, %v820_v39  ;;  %v1170_v38 = vsub.s32 5, %v2281_v58 }
 0x179   : > { %v1210_v39 = vsub.s32 7, %v2281_v58 }
 0x17a   : > { %v883_v46 = vadd.f32 1e-06, %v871_v43  ;;  %v861_v47 = vmul.f32 %v2273_v44, %v2273_v44  ;;  %v872_v48 = vsub.f32 %v848_v45, %v860_v41 }
 0x17b   : > { %v823_v51 = vpop.xlane.xlu0 %822  ;;  %v765_v53 = vpop.xlane.xlu1 %764 }
 0x17c   : > { %1921 = vrsqrt.f32 %v883_v46  ;;  %v884_v54 = vadd.f32 1e-06, %v872_v48  ;;  %v849_v55 = vmul.f32 0.0625, %v823_v51  ;;  %v2279_v56 = vmul.f32 0.0625, %v765_v53 }
 0x17d   : > { %v1190_v46 = vsub.s32 6, %v2281_v58  ;;  %v2330_v48 = vrot.slane %v1059_v15, %v1110_v12  ;;  %v907_v51 = vsub.f32 %v2175_v25, %v2266_v35 }
 0x17e   : > { %1923 = vrsqrt.f32 %v884_v54  ;;  %v873_v57 = vsub.f32 %v849_v55, %v861_v47  ;;  %v862_v7 = vmul.f32 %v2279_v56, %v2279_v56  ;;  %v908_v54 = vsub.f32 %v2167_v20, %v2264_v34 }
 0x17f   : > { %v768_v59 = vpop.xlane.xlu0 %767  ;;  %v826_v61 = vpop.xlane.xlu1 %825  ;;  %v2337_v55 = vrot.slane %v1059_v15, %v1063_v24  ;;  %v2349_v34 = vrot.slane %v1059_v15, %v1170_v38 }
 0x180   : > { %v885_v0 = vadd.f32 1e-06, %v873_v57  ;;  %v2285_v1 = vmul.f32 0.0625, %v768_v59  ;;  %v850_v2 = vmul.f32 0.0625, %v826_v61  ;;  %v2339_v57 = vrot.slane %v1059_v15, %v1150_v26 }
 0x181   : > { %v1918_v3 = vpop.eup %1917  ;;  %v2341_v59 = vrot.slane %v1059_v15, %v1130_v31 }
 0x182   : > { %v917_v9 = vmul.f32 %v1918_v3, %v905_v63  ;;  %1925 = vrsqrt.f32 %v885_v0  ;;  %v863_v17 = vmul.f32 %v2285_v1, %v2285_v1  ;;  %v874_v13 = vsub.f32 %v850_v2, %v862_v7 }
 0x183   : > { %v1920_v10 = vpop.eup %1919  ;;  %v829_v14 = vpop.xlane.xlu0 %828  ;;  %v2351_v2 = vrot.slane %v1059_v15, %v1190_v46  ;;  %v2353_v3 = vrot.slane %v1059_v15, %v1210_v39  ;;  %v911_v15 = vsub.f32 %v2201_v42, %v2285_v1 }
 0x184   : > { %v771_v18 = vpop.xlane.xlu1 %770  ;;  %v936_v16 = vmul.f32 %v2290_v5, %v917_v9  ;;  %v918_v21 = vmul.f32 %v1920_v10, %v906_v8  ;;  %v851_v22 = vmul.f32 0.0625, %v829_v14  ;;  %v886_v27 = vadd.f32 1e-06, %v874_v13 }
 0x185   : > { %v2321_v33 = vmul.f32 0.0625, %v771_v18  ;;  %v910_v10 = vsub.f32 %v2197_v40, %v2279_v56  ;;  %v2362_v13 = vstv %s560_s17  ;;  %v2375_v40 = vld [vmem:[%s2817_s8] ss:$0 sm:$0xff] }
 0x186   : > { %v955_v28 = vadd.f32 %v2303_v11, %v936_v16  ;;  %v937_v29 = vmul.f32 %v2290_v5, %v918_v21  ;;  %v875_v30 = vsub.f32 %v851_v22, %v863_v17  ;;  %1927 = vrsqrt.f32 %v886_v27 }
 0x187   : > { %v774_v36 = vpop.xlane.xlu0 %773  ;;  %v864_v0 = vmul.f32 %v2321_v33, %v2321_v33  ;;  %v909_v17 = vsub.f32 %v2185_v32, %v2273_v44  ;;  %v912_v1 = vsub.f32 %v2213_v50, %v2321_v33 }
 0x188   : > { %v832_v37 = vpop.xlane.xlu1 %831  ;;  %v2325_v41 = vmul.f32 %v967_v19, %v955_v28  ;;  %v887_v43 = vadd.f32 1e-06, %v875_v30  ;;  %v2327_v45 = vmul.f32 0.0625, %v774_v36  ;;  %v956_v49 = vadd.f32 %v2303_v11, %v937_v29 }
 0x189   : > { %v1922_v47 = vpop.eup %1921  ;;  %v852_v53 = vmul.f32 0.0625, %v832_v37 }
 0x18a   : > { %v986_v61 = vrot.slane %v2325_v41, 7  ;;  %v919_v63 = vmul.f32 %v1922_v47, %v907_v51  ;;  %1929 = vrsqrt.f32 %v887_v43  ;;  %v865_v20 = vmul.f32 %v2327_v45, %v2327_v45 }
 0x18b   : > { %v1924_v58 = vpop.eup %1923  ;;  %v835_v25 = vpop.xlane.xlu0 %834  ;;  %v2355_v6 = vmul.f32 %v967_v19, %v956_v49  ;;  %v876_v9 = vsub.f32 %v852_v53, %v864_v0  ;;  %v1023_v26 = vrot.slane %v2325_v41, 1  ;;  %v1112_v46 = vmul.f32 %v2330_v48, %v2325_v41 }
 0x18c   : > { %v777_v35 = vpop.xlane.xlu1 %776  ;;  %v938_v7 = vmul.f32 %v2290_v5, %v919_v63  ;;  %v920_v8 = vmul.f32 %v1924_v58, %v908_v54  ;;  %v853_v12 = vmul.f32 0.0625, %v835_v25  ;;  %v1016_v18 = vsel %vm985_vm3, 0.0, %v986_v61 }
 0x18d   : > { %v888_v16 = vadd.f32 1e-06, %v876_v9  ;;  %v2378_v24 = vmul.f32 0.0625, %v777_v35  ;;  %v1024_v27 = vrot.slane %v2355_v6, 1  ;;  %v1092_v28 = vmul.f32 %v2310_v23, %v1016_v18 }
 0x18e   : > { %v2368_v19 = vadd.f32 %v2303_v11, %v938_v7  ;;  %v939_v44 = vmul.f32 %v2290_v5, %v920_v8  ;;  %v877_v22 = vsub.f32 %v853_v12, %v865_v20  ;;  %v913_v49 = vsub.f32 %v2217_v52, %v2327_v45 }
 0x18f   : > { %v1926_v14 = vpop.eup %1925  ;;  %v780_v21 = vpop.xlane.xlu0 %779  ;;  %1931 = vrsqrt.f32 %v888_v16  ;;  %v866_v51 = vmul.f32 %v2378_v24, %v2378_v24  ;;  %v987_v54 = vrot.slane %v2355_v6, 7  ;;  %v1025_v20 = vsel %vm1022_vm4, %v1023_v26, %v1024_v27 }
 0x190   : > { %v838_v32 = vpop.xlane.xlu1 %837  ;;  %v921_v56 = vmul.f32 %v1926_v14, %v909_v17  ;;  %v1065_v42 = vmul.f32 %v2337_v55, %v2368_v19  ;;  %v889_v30 = vadd.f32 1e-06, %v877_v22  ;;  %v989_v31 = vrot.slane %v2368_v19, 7 }
 0x191   : > { %v2390_v37 = vmul.f32 0.0625, %v780_v21  ;;  %v854_v38 = vmul.f32 0.0625, %v838_v32  ;;  %v2395_v47 = vadd.f32 %v2303_v11, %v939_v44  ;;  %v1113_v26 = vmul.f32 %v2330_v48, %v2355_v6 }
 0x192   : > { %v940_v29 = vmul.f32 %v2290_v5, %v921_v56  ;;  %v1080_v36 = vadd.f32 %v2375_v40, %v1065_v42  ;;  %1933 = vrsqrt.f32 %v889_v30  ;;  %v1017_v7 = vsel %vm985_vm3, 0.0, %v989_v31 }
 0x193   : > { %v1928_v43 = vpop.eup %1927  ;;  %v841_v53 = vpop.xlane.xlu0 %840  ;;  %v867_v25 = vmul.f32 %v2390_v37, %v2390_v37  ;;  %v878_v35 = vsub.f32 %v854_v38, %v866_v51  ;;  %v1027_v21 = vrot.slane %v2395_v47, 1  ;;  %v1026_v42 = vrot.slane %v2368_v19, 1 }
 0x194   : > { %v783_v39 = vpop.xlane.xlu1 %782  ;;  %v1100_v58 = vadd.f32 %v1092_v28, %v1080_v36  ;;  %v922_v63 = vmul.f32 %v1928_v43, %v910_v10  ;;  %v2403_v0 = vadd.f32 %v2303_v11, %v940_v29  ;;  %v855_v9 = vmul.f32 0.0625, %v841_v53 }
 0x195   : > { %v2414_v17 = vmul.f32 0.0625, %v783_v39  ;;  %v890_v18 = vadd.f32 1e-06, %v878_v35  ;;  %v1132_v29 = vmul.f32 %v2341_v59, %v1025_v20  ;;  %v1066_v39 = vmul.f32 %v2337_v55, %v2395_v47 }
 0x196   : > { %v941_v8 = vmul.f32 %v2290_v5, %v922_v63  ;;  %v1120_v14 = vadd.f32 %v1112_v46, %v1100_v58  ;;  %v879_v56 = vsub.f32 %v855_v9, %v867_v25  ;;  %v992_v28 = vrot.slane %v2403_v0, 7 }
 0x197   : > { %v1930_v12 = vpop.eup %1929  ;;  %v868_v22 = vmul.f32 %v2414_v17, %v2414_v17  ;;  %1935 = vrsqrt.f32 %v890_v18  ;;  %v1028_v43 = vsel %vm1022_vm4, %v1026_v42, %v1027_v21  ;;  %v988_v63 = vsel %vm985_vm3, %v986_v61, %v987_v54  ;;  %v2468_v18 = vld [vmem:[%s2816_s7 + $0x8] ss:$0 sm:$0xff] }
 0x198   : > { %v844_v10 = vpop.xlane.xlu1 %843  ;;  %v2418_v32 = vadd.f32 %v2303_v11, %v941_v8  ;;  %v923_v44 = vmul.f32 %v1930_v12, %v911_v15  ;;  %v891_v36 = vadd.f32 1e-06, %v879_v56  ;;  %v1152_v15 = vmul.f32 %v2339_v57, %v1017_v7 }
 0x199   : > { %v856_v16 = vmul.f32 0.0625, %v844_v10  ;;  %v1140_v58 = vadd.f32 %v1132_v29, %v1120_v14  ;;  %v2443_v25 = vmul.f32 %v2330_v48, %v2368_v19  ;;  %v914_v35 = vsub.f32 %v2229_v60, %v2378_v24 }
 0x19a   : > { %v942_v30 = vmul.f32 %v2290_v5, %v923_v44  ;;  %v1030_v46 = vrot.slane %v2418_v32, 1  ;;  %1937 = vrsqrt.f32 %v891_v36  ;;  %v2448_v20 = vsel %vm985_vm3, 0.0, %v992_v28 }
 0x19b   : > { %v880_v38 = vsub.f32 %v856_v16, %v868_v22  ;;  %v1029_v9 = vrot.slane %v2403_v0, 1  ;;  %v1160_v10 = vadd.f32 %v1152_v15, %v1140_v58  ;;  %v1172_v12 = vmul.f32 %v2349_v34, %v1028_v43 }
 0x19c   : > { %v2436_v51 = vadd.f32 %v2303_v11, %v942_v30  ;;  %v1932_v8 = vpop.eup %1931  ;;  %v2453_v41 = vmul.f32 %v2310_v23, %v1017_v7  ;;  %v990_v61 = vrot.slane %v2395_v47, 7  ;;  %v1081_v54 = vadd.f32 %v2375_v40, %v1066_v39 }
 0x19d   : > { %v892_v53 = vadd.f32 1e-06, %v880_v38  ;;  %v924_v24 = vmul.f32 %v1932_v8, %v912_v1  ;;  %v2463_v14 = vsel %vm1022_vm4, %v1029_v9, %v1030_v46  ;;  %v1180_v7 = vadd.f32 %v1172_v12, %v1160_v10 }
 0x19e   : > { %v1069_v60 = vmul.f32 %v2337_v55, %v2436_v51  ;;  %v1192_v16 = vmul.f32 %v2351_v2, %v2448_v20  ;;  %v915_v56 = vsub.f32 %v2233_v62, %v2390_v37  ;;  %v916_v50 = vsub.f32 %v2245_v4, %v2414_v17 }
 0x19f   : > { %1939 = vrsqrt.f32 %v892_v53  ;;  %v1934_v44 = vpop.eup %1933  ;;  %v1212_v33 = vmul.f32 %v2353_v3, %v2403_v0  ;;  %v1093_v1 = vmul.f32 %v2310_v23, %v988_v63  ;;  %v993_v29 = vrot.slane %v2418_v32, 7 }
 0x1a0   : > { %v925_v22 = vmul.f32 %v1934_v44, %v913_v49  ;;  %v1200_v42 = vadd.f32 %v1192_v16, %v1180_v7  ;;  %v1053_v30 = vsel %vm1022_vm4, %v1024_v27, 0.0  ;;  %v1084_v62 = vadd.f32 %v2375_v40, %v1069_v60 }
 0x1a1   : > { %v1096_v4 = vmul.f32 %v2310_v23, %v2448_v20  ;;  %v1232_v37 = vmul.f32 %v2468_v18, %v2463_v14  ;;  %v1101_v17 = vadd.f32 %v1093_v1, %v1081_v54  ;;  %v943_v36 = vmul.f32 %v2290_v5, %v924_v24 }
 0x1a2   : > { %v944_v52 = vmul.f32 %v2290_v5, %v925_v22  ;;  %v1220_v45 = vadd.f32 %v1212_v33, %v1200_v42  ;;  %v2496_v6 = vsel %vm985_vm3, %v989_v31, %v990_v61  ;;  %v1116_v27 = vmul.f32 %v2330_v48, %v2403_v0 }
 0x1a3   : > { %v1134_v49 = vmul.f32 %v2341_v59, %v1028_v43  ;;  %v1121_v38 = vadd.f32 %v1113_v26, %v1101_v17  ;;  %v1133_v15 = vmul.f32 %v2341_v59, %v1053_v30  ;;  %v2508_v58 = vsel %vm985_vm3, %v992_v28, %v993_v29 }
 0x1a4   : > { %v2503_v39 = vadd.f32 %v2303_v11, %v944_v52  ;;  %v2505_v53 = vadd.f32 %v1232_v37, %v1220_v45  ;;  %v2513_v19 = vsel %vm1022_vm4, %v1027_v21, 0.0  ;;  %v1936_v31 = vpop.eup %1935  ;;  %v1104_v63 = vadd.f32 %v1096_v4, %v1084_v62 }
 0x1a5   : > { %v1141_v8 = vadd.f32 %v1133_v15, %v1121_v38  ;;  %v1153_v26 = vmul.f32 %v2339_v57, %v2496_v6  ;;  %v995_v43 = vrot.slane %v2436_v51, 7  ;;  %v2519_v9 = vadd.f32 %v2303_v11, %v943_v36 }
 0x1a6   : > { %v1136_v28 = vmul.f32 %v2341_v59, %v2463_v14  ;;  %v1248_v10 = vand.u32 2147483647, %v2505_v53  ;;  %v2525_v12 = vsel %vm1022_vm4, %v1030_v46, 0.0  ;;  %v1173_v54 = vmul.f32 %v2349_v34, %v2513_v19 }
 0x1a7   : > { %v1938_v21 = vpop.eup %1937  ;;  %v1161_v61 = vadd.f32 %v1153_v26, %v1141_v8  ;;  %v1193_v60 = vmul.f32 %v2351_v2, %v2508_v58  ;;  %v1067_v24 = vmul.f32 %v2337_v55, %v2403_v0  ;;  %v926_v7 = vmul.f32 %v1936_v31, %v914_v35 }
 0x1a8   : > { %v927_v16 = vmul.f32 %v1938_v21, %v915_v56  ;;  %v1256_v44 = vmul.f32 0.70710677, %v1248_v10  ;;  %v1071_v33 = vmul.f32 %v2337_v55, %v2503_v39  ;;  %v1124_v46 = vadd.f32 %v1116_v27, %v1104_v63 }
 0x1a9   : > { %v1181_v22 = vadd.f32 %v1173_v54, %v1161_v61  ;;  %v2538_v42 = vsel %vm985_vm3, 0.0, %v995_v43  ;;  %v1082_v29 = vadd.f32 %v2375_v40, %v1067_v24  ;;  %v1213_v4 = vmul.f32 %v2353_v3, %v2418_v32 }
 0x1aa   : > { %v946_v30 = vmul.f32 %v2290_v5, %v927_v16  ;;  %v1264_v0 = vmul.f32 0.3275911, %v1256_v44  ;;  %v1376_v35 = vsub.f32 0.0, %v1256_v44  ;;  %v1086_v37 = vadd.f32 %v2375_v40, %v1071_v33 }
 0x1ab   : > { %v1201_v56 = vadd.f32 %v1193_v60, %v1181_v22  ;;  %v1102_v17 = vadd.f32 %v2453_v41, %v1082_v29  ;;  %v945_v36 = vmul.f32 %v2290_v5, %v926_v7  ;;  %v1098_v15 = vmul.f32 %v2310_v23, %v2538_v42 }
 0x1ac   : > { %v1940_v1 = vpop.eup %1939  ;;  %v2548_v52 = vadd.f32 %v2303_v11, %v946_v30  ;;  %v1272_v27 = vadd.f32 1.0, %v1264_v0  ;;  %v1384_v41 = vmul.f32 %v1376_v35, %v1256_v44  ;;  %v1033_v8 = vrot.slane %v2519_v9, 1 }
 0x1ad   : > { %v928_v62 = vmul.f32 %v1940_v1, %v916_v50  ;;  %v1221_v38 = vadd.f32 %v1213_v4, %v1201_v56  ;;  %v1233_v50 = vmul.f32 %v2468_v18, %v2525_v12  ;;  %v1122_v31 = vadd.f32 %v2443_v25, %v1102_v17 }
 0x1ae   : > { %1941 = vrcp.f32 %v1272_v27  ;;  %v1154_v21 = vmul.f32 %v2339_v57, %v2448_v20  ;;  %v2565_v61 = vadd.f32 %v2303_v11, %v945_v36  ;;  %v1174_v25 = vmul.f32 %v2349_v34, %v2463_v14 }
 0x1af   : > { %v947_v45 = vmul.f32 %v2290_v5, %v928_v62  ;;  %v2560_v26 = vadd.f32 %v1233_v50, %v1221_v38  ;;  %v1106_v5 = vadd.f32 %v1098_v15, %v1086_v37  ;;  %v1142_v10 = vadd.f32 %v1134_v49, %v1122_v31 }
 0x1b0   : > { %v2571_v54 = vmul.f32 %v2310_v23, %v2508_v58  ;;  %v1032_v60 = vrot.slane %v2436_v51, 1  ;;  %v1118_v49 = vmul.f32 %v2330_v48, %v2436_v51  ;;  %v1194_v20 = vmul.f32 %v2351_v2, %v2538_v42 }
 0x1b1   : > { %v2557_v63 = vadd.f32 %v2303_v11, %v947_v45  ;;  %v1249_v24 = vand.u32 2147483647, %v2560_v26  ;;  %v1162_v7 = vadd.f32 %v1154_v21, %v1142_v10  ;;  %v1144_v11 = vadd.f32 %v1136_v28, %v1124_v46 }
 0x1b2   : > { %v2581_v16 = vmul.f32 %v2341_v59, %v2525_v12  ;;  %v1034_v14 = vsel %vm1022_vm4, %v1032_v60, %v1033_v8  ;;  %v1068_v44 = vmul.f32 %v2337_v55, %v2418_v32  ;;  %v1392_v33 = vmul.f32 1.442695, %v1384_v41 }
 0x1b3   : > { %v1257_v1 = vmul.f32 0.70710677, %v1249_v24  ;;  %v1126_v22 = vadd.f32 %v1118_v49, %v1106_v5  ;;  %v1182_v29 = vadd.f32 %v1174_v25, %v1162_v7  ;;  %v1214_v30 = vmul.f32 %v2353_v3, %v2436_v51 }
 0x1b4   : > { %v996_v62 = vrot.slane %v2519_v9, 7  ;;  %v1083_v28 = vadd.f32 %v2375_v40, %v1068_v44  ;;  %v1095_v46 = vmul.f32 %v2310_v23, %v2496_v6  ;;  %v1234_v56 = vmul.f32 %v2468_v18, %v1034_v14 }
 0x1b5   : > { %v1265_v0 = vmul.f32 0.3275911, %v1257_v1  ;;  %v1202_v35 = vadd.f32 %v1194_v20, %v1182_v29  ;;  %v1072_v4 = vmul.f32 %v2337_v55, %v2565_v61  ;;  %v1138_v37 = vmul.f32 %v2341_v59, %v1034_v14 }
 0x1b6   : > { %v1176_v17 = vmul.f32 %v2349_v34, %v1034_v14  ;;  %v1103_v36 = vadd.f32 %v1095_v46, %v1083_v28  ;;  %v1115_v45 = vmul.f32 %v2330_v48, %v2395_v47  ;;  %1943 = vpow2.f32 %v1392_v33 }
 0x1b7   : > { %v1273_v27 = vadd.f32 1.0, %v1265_v0  ;;  %v1377_v38 = vsub.f32 0.0, %v1257_v1  ;;  %v1222_v50 = vadd.f32 %v1214_v30, %v1202_v35  ;;  %v2599_v6 = vadd.f32 %v1138_v37, %v1126_v22 }
 0x1b8   : > { %v2604_v15 = vsel %vm985_vm3, %v995_v43, %v996_v62  ;;  %v1123_v31 = vadd.f32 %v1115_v45, %v1103_v36  ;;  %v1135_v41 = vmul.f32 %v2341_v59, %v2513_v19  ;;  %v1056_v47 = vsel %vm1022_vm4, %v1033_v8, 0.0 }
 0x1b9   : > { %1945 = vrcp.f32 %v1273_v27  ;;  %v2608_v5 = vadd.f32 %v1234_v56, %v1222_v50  ;;  %v1087_v10 = vadd.f32 %v2375_v40, %v1072_v4  ;;  %v1119_v21 = vmul.f32 %v2330_v48, %v2519_v9 }
 0x1ba   : > { %v1143_v25 = vadd.f32 %v1135_v41, %v1123_v31  ;;  %v1155_v51 = vmul.f32 %v2339_v57, %v2508_v58  ;;  %v998_v43 = vrot.slane %v2503_v39, 7  ;;  %v1385_v24 = vmul.f32 %v1377_v38, %v1257_v1 }
 0x1bb   : > { %v2617_v60 = vpop.eup %1941  ;;  %v1250_v19 = vand.u32 2147483647, %v2608_v5  ;;  %v1099_v49 = vmul.f32 %v2310_v23, %v2604_v15  ;;  %v1175_v8 = vmul.f32 %v2349_v34, %v2525_v12  ;;  %v1195_v14 = vmul.f32 %v2351_v2, %v2604_v15 }
 0x1bc   : > { %v1296_v7 = vmul.f32 1.0614054, %v2617_v60  ;;  %v1163_v20 = vadd.f32 %v1155_v51, %v1143_v25  ;;  %v1020_v58 = vsel %vm985_vm3, 0.0, %v998_v43  ;;  %v1036_v1 = vrot.slane %v2565_v61, 1 }
 0x1bd   : > { %v1258_v44 = vmul.f32 0.70710677, %v1250_v19  ;;  %v1107_v33 = vadd.f32 %v1099_v49, %v1087_v10  ;;  %v1156_v23 = vmul.f32 %v2339_v57, %v2538_v42  ;;  %v1139_v12 = vmul.f32 %v2341_v59, %v1056_v47 }
 0x1be   : > { %v1304_v22 = vadd.f32 -1.4531521, %v1296_v7  ;;  %v1183_v29 = vadd.f32 %v1175_v8, %v1163_v20  ;;  %v1035_v30 = vrot.slane %v2503_v39, 1  ;;  %v1394_v62 = vmul.f32 1.442695, %v1385_v24 }
 0x1bf   : > { %v1266_v28 = vmul.f32 0.3275911, %v1258_v44  ;;  %v1164_v46 = vadd.f32 %v1156_v23, %v1144_v11  ;;  %v1196_v0 = vmul.f32 %v2351_v2, %v1020_v58  ;;  %v1215_v4 = vmul.f32 %v2353_v3, %v2519_v9 }
 0x1c0   : > { %v1312_v35 = vmul.f32 %v2617_v60, %v1304_v22  ;;  %v1203_v56 = vadd.f32 %v1195_v14, %v1183_v29  ;;  %v1037_v37 = vsel %vm1022_vm4, %v1035_v30, %v1036_v1  ;;  %v1378_v36 = vsub.f32 0.0, %v1258_v44 }
 0x1c1   : > { %v1274_v42 = vadd.f32 1.0, %v1266_v28  ;;  %v1127_v45 = vadd.f32 %v1119_v21, %v1107_v33  ;;  %v1184_v59 = vadd.f32 %v1176_v17, %v1164_v46  ;;  %v1235_v50 = vmul.f32 %v2468_v18, %v1056_v47 }
 0x1c2   : > { %v1320_v27 = vadd.f32 1.4214138, %v1312_v35  ;;  %v1223_v38 = vadd.f32 %v1215_v4, %v1203_v56  ;;  %v1070_v11 = vmul.f32 %v2337_v55, %v2519_v9  ;;  %v1216_v41 = vmul.f32 %v2353_v3, %v2503_v39 }
 0x1c3   : > { %1947 = vrcp.f32 %v1274_v42  ;;  %v1204_v31 = vadd.f32 %v1196_v0, %v1184_v59  ;;  %v1236_v10 = vmul.f32 %v2468_v18, %v1037_v37  ;;  %v1944_v25 = vpop.eup %1943  ;;  %v1177_v21 = vmul.f32 %v2349_v34, %v1056_v47 }
 0x1c4   : > { %v1328_v51 = vmul.f32 %v2617_v60, %v1320_v27  ;;  %v2648_v17 = vadd.f32 %v1235_v50, %v1223_v38  ;;  %v1085_v24 = vadd.f32 %v2375_v40, %v1070_v11  ;;  %1949 = vpow2.f32 %v1394_v62 }
 0x1c5   : > { %v1386_v19 = vmul.f32 %v1378_v36, %v1258_v44  ;;  %v1224_v49 = vadd.f32 %v1216_v41, %v1204_v31  ;;  %v999_v55 = vrot.slane %v2565_v61, 7  ;;  %v1117_v14 = vmul.f32 %v2330_v48, %v2418_v32 }
 0x1c6   : > { %v2652_v9 = vpop.eup %1945  ;;  %v1336_v8 = vadd.f32 -0.28449672, %v1328_v51  ;;  %v1251_v7 = vand.u32 2147483647, %v2648_v17  ;;  %v1105_v20 = vadd.f32 %v2571_v54, %v1085_v24  ;;  %v2659_v33 = vadd.f32 %v1139_v12, %v1127_v45 }
 0x1c7   : > { %v1297_v47 = vmul.f32 1.0614054, %v2652_v9  ;;  %v1158_v40 = vmul.f32 %v2339_v57, %v1020_v58  ;;  %v2662_v44 = vadd.f32 %v1236_v10, %v1224_v49  ;;  %v1178_v29 = vmul.f32 %v2349_v34, %v1037_v37 }
 0x1c8   : > { %v1344_v23 = vmul.f32 %v2617_v60, %v1336_v8  ;;  %v1259_v22 = vmul.f32 0.70710677, %v1251_v7  ;;  %v1125_v30 = vadd.f32 %v1117_v14, %v1105_v20  ;;  %v1396_v28 = vmul.f32 1.442695, %v1386_v19 }
 0x1c9   : > { %v1305_v62 = vadd.f32 -1.4531521, %v1297_v47  ;;  %v1252_v54 = vand.u32 2147483647, %v2662_v44  ;;  %v1000_v48 = vsel %vm985_vm3, %v998_v43, %v999_v55  ;;  %v1157_v46 = vmul.f32 %v2339_v57, %v2604_v15 }
 0x1ca   : > { %v1352_v32 = vadd.f32 0.2548296, %v1344_v23  ;;  %v1267_v12 = vmul.f32 0.3275911, %v1259_v22  ;;  %v1145_v58 = vadd.f32 %v2581_v16, %v1125_v30  ;;  %vm1416_vm5 = vcmp.ge.f32.partialorder %v2505_v53, 0.0 }
 0x1cb   : > { %v1313_v0 = vmul.f32 %v2652_v9, %v1305_v62  ;;  %v2675_v35 = vmul.f32 0.70710677, %v1252_v54  ;;  %v1057_v56 = vsel %vm1022_vm4, %v1036_v1, 0.0  ;;  %v971_v39 = vmul.f32 %v2362_v13, %v2548_v52 }
 0x1cc   : > { %v1360_v43 = vmul.f32 %v2617_v60, %v1352_v32  ;;  %v1275_v4 = vadd.f32 1.0, %v1267_v12  ;;  %v1165_v37 = vadd.f32 %v1157_v46, %v1145_v58  ;;  %v1197_v16 = vmul.f32 %v2351_v2, %v1000_v48 }
 0x1cd   : > { %v1321_v42 = vadd.f32 1.4214138, %v1313_v0  ;;  %1951 = vpow2.f32 %v1396_v28  ;;  %v1268_v15 = vmul.f32 0.3275911, %v2675_v35  ;;  %v1001_v36 = vrot.slane %v971_v39, 7 }
 0x1ce   : > { %v1368_v45 = vmul.f32 0.5, %v1360_v43  ;;  %1953 = vrcp.f32 %v1275_v4  ;;  %v1185_v59 = vadd.f32 %v1177_v21, %v1165_v37  ;;  %v2685_v1 = vmul.f32 %v2362_v13, %v2557_v63 }
 0x1cf   : > { %v1329_v52 = vmul.f32 %v2652_v9, %v1321_v42  ;;  %v1276_v27 = vadd.f32 1.0, %v1268_v15  ;;  %v1217_v60 = vmul.f32 %v2353_v3, %v2565_v61  ;;  %v1237_v38 = vmul.f32 %v2468_v18, %v1057_v56 }
 0x1d0   : > { %v2691_v50 = vpop.eup %1947  ;;  %v1408_v11 = vmul.f32 %v1944_v25, %v1368_v45  ;;  %v1379_v31 = vsub.f32 0.0, %v1259_v22  ;;  %v1205_v41 = vadd.f32 %v1197_v16, %v1185_v59  ;;  %v1021_v10 = vsel %vm985_vm3, 0.0, %v1001_v36 }
 0x1d1   : > { %v1337_v51 = vadd.f32 -0.28449672, %v1329_v52  ;;  %v1298_v21 = vmul.f32 1.0614054, %v2691_v50  ;;  %1955 = vrcp.f32 %v1276_v27  ;;  %v1038_v13 = vrot.slane %v971_v39, 1  ;;  %v1950_v63 = vpop.eup %1949 }
 0x1d2   : > { %v1424_v24 = vsub.f32 1.0, %v1408_v11  ;;  %v1225_v19 = vadd.f32 %v1217_v60, %v1205_v41  ;;  %v1039_v49 = vrot.slane %v2685_v1, 1  ;;  %v1166_v61 = vadd.f32 %v1158_v40, %v2599_v6 }
 0x1d3   : > { %v1345_v55 = vmul.f32 %v2652_v9, %v1337_v51  ;;  %v1306_v8 = vadd.f32 -1.4531521, %v1298_v21  ;;  %v1159_v25 = vmul.f32 %v2339_v57, %v1000_v48  ;;  %v1198_v7 = vmul.f32 %v2351_v2, %v1021_v10 }
 0x1d4   : > { %v1432_v20 = vsel %vm1416_vm5, %v1424_v24, %v1408_v11  ;;  %v2702_v14 = vadd.f32 %v1237_v38, %v1225_v19  ;;  %v1040_v47 = vsel %vm1022_vm4, %v1038_v13, %v1039_v49  ;;  %v1186_v23 = vadd.f32 %v1178_v29, %v1166_v61 }
 0x1d5   : > { %v1440_v30 = vmul.f32 %v1432_v20, %v2505_v53  ;;  %v1353_v62 = vadd.f32 0.2548296, %v1345_v55  ;;  %v1314_v6 = vmul.f32 %v2691_v50, %v1306_v8  ;;  %v1387_v40 = vmul.f32 %v1379_v31, %v1259_v22 }
 0x1d6   : > { %v1253_v28 = vand.u32 2147483647, %v2702_v14  ;;  %v1206_v54 = vadd.f32 %v1198_v7, %v1186_v23  ;;  %v1218_v57 = vmul.f32 %v2353_v3, %v971_v39  ;;  %v1238_v48 = vmul.f32 %v2468_v18, %v1040_v47 }
 0x1d7   : > { %1863 = vmatprep.mubr.msk.f32.mxu1 %vm747_vm2, %v1440_v30  ;;  %v1361_v32 = vmul.f32 %v2652_v9, %v1353_v62  ;;  %v1322_v12 = vadd.f32 1.4214138, %v1314_v6  ;;  %v1179_v29 = vmul.f32 %v2349_v34, %v1057_v56  ;;  %v1002_v53 = vrot.slane %v2685_v1, 7 }
 0x1d8   : > { %v1380_v58 = vsub.f32 0.0, %v2675_v35  ;;  %v2715_v46 = vmul.f32 0.70710677, %v1253_v28  ;;  %v1226_v22 = vadd.f32 %v1218_v57, %v1206_v54  ;;  %v1167_v0 = vadd.f32 %v1159_v25, %v2659_v33 }
 0x1d9   : > { %v1369_v43 = vmul.f32 0.5, %v1361_v32  ;;  %vm1417_vm6 = vcmp.ge.f32.partialorder %v2560_v26, 0.0  ;;  %v1330_v39 = vmul.f32 %v2691_v50, %v1322_v12  ;;  %v1003_v4 = vsel %vm985_vm3, %v1001_v36, %v1002_v53 }
 0x1da   : > { %v1952_v9 = vpop.eup %1951  ;;  %v1398_v37 = vmul.f32 1.442695, %v1387_v40  ;;  %v1269_v34 = vmul.f32 0.3275911, %v2715_v46  ;;  %v2722_v56 = vadd.f32 %v1238_v48, %v1226_v22  ;;  %v1187_v16 = vadd.f32 %v1179_v29, %v1167_v0 }
 0x1db   : > { %v1954_v42 = vpop.eup %1953  ;;  %v1409_v15 = vmul.f32 %v1950_v63, %v1369_v43  ;;  %v1338_v45 = vadd.f32 -0.28449672, %v1330_v39  ;;  %v1058_v59 = vsel %vm1022_vm4, %v1039_v49, 0.0  ;;  %v1199_v33 = vmul.f32 %v2351_v2, %v1003_v4 }
 0x1dc   : > { %v1299_v52 = vmul.f32 1.0614054, %v1954_v42  ;;  %v1388_v27 = vmul.f32 %v1380_v58, %v2675_v35  ;;  %v1277_v60 = vadd.f32 1.0, %v1269_v34  ;;  %v1254_v36 = vand.u32 2147483647, %v2722_v56 }
 0x1dd   : > { %v1425_v38 = vsub.f32 1.0, %v1409_v15  ;;  %v1346_v11 = vmul.f32 %v2691_v50, %v1338_v45  ;;  %v1207_v31 = vadd.f32 %v1199_v33, %v1187_v16  ;;  %v1219_v41 = vmul.f32 %v2353_v3, %v2685_v1 }
 0x1de   : > { %v1956_v10 = vpop.eup %1955  ;;  %v1307_v51 = vadd.f32 -1.4531521, %v1299_v52  ;;  %1957 = vrcp.f32 %v1277_v60  ;;  %v1262_v21 = vmul.f32 0.70710677, %v1254_v36  ;;  %v1239_v13 = vmul.f32 %v2468_v18, %v1058_v59 }
 0x1df   : > { %v1433_v2 = vsel %vm1417_vm6, %v1425_v38, %v1409_v15  ;;  %v1354_v35 = vadd.f32 0.2548296, %v1346_v11  ;;  %v1300_v63 = vmul.f32 1.0614054, %v1956_v10  ;;  %v1227_v24 = vadd.f32 %v1219_v41, %v1207_v31 }
 0x1e0   : > { %v1441_v19 = vmul.f32 %v1433_v2, %v2560_v26  ;;  %v1315_v49 = vmul.f32 %v1954_v42, %v1307_v51  ;;  %v1270_v61 = vmul.f32 0.3275911, %v1262_v21  ;;  %v1400_v3 = vmul.f32 1.442695, %v1388_v27 }
 0x1e1   : > { %v1362_v55 = vmul.f32 %v2691_v50, %v1354_v35  ;;  %v1308_v8 = vadd.f32 -1.4531521, %v1300_v63  ;;  %v2736_v1 = vadd.f32 %v1239_v13, %v1227_v24  ;;  %1959 = vpow2.f32 %v1398_v37 }
 0x1e2   : > { %1864 = vmatmul.mubr.msk.f32.vlgmr.msra.gmra.mxu1 %vm747_vm2, %v1441_v19  ;;  %v1323_v25 = vadd.f32 1.4214138, %v1315_v49  ;;  %v1278_v18 = vadd.f32 1.0, %v1270_v61  ;;  %v1381_v6 = vsub.f32 0.0, %v2715_v46  ;;  %vm1418_vm7 = vcmp.ge.f32.partialorder %v2608_v5, 0.0 }
 0x1e3   : > { %v1370_v7 = vmul.f32 0.5, %v1362_v55  ;;  %v1316_v20 = vmul.f32 %v1956_v10, %v1308_v8  ;;  %v1255_v47 = vand.u32 2147483647, %v2736_v1  ;;  %v1382_v4 = vsub.f32 0.0, %v1262_v21 }
 0x1e4   : > { %v1331_v23 = vmul.f32 %v1954_v42, %v1323_v25  ;;  %1961 = vrcp.f32 %v1278_v18  ;;  %v1389_v58 = vmul.f32 %v1381_v6, %v2715_v46  ;;  %vm1419_vm8 = vcmp.ge.f32.partialorder %v2648_v17, 0.0 }
 0x1e5   : > { %v1410_v26 = vmul.f32 %v1952_v9, %v1370_v7  ;;  %v1324_v30 = vadd.f32 1.4214138, %v1316_v20  ;;  %1963 = vpow2.f32 %v1400_v3  ;;  %v1263_v62 = vmul.f32 0.70710677, %v1255_v47 }
 0x1e6   : > { %v1339_v50 = vadd.f32 -0.28449672, %v1331_v23  ;;  %v1402_v16 = vmul.f32 1.442695, %v1389_v58  ;;  %vm1420_vm9 = vcmp.ge.f32.partialorder %v2662_v44, 0.0  ;;  %vm1421_vm10 = vcmp.ge.f32.partialorder %v2702_v14, 0.0 }
 0x1e7   : > { %v1426_v40 = vsub.f32 1.0, %v1410_v26  ;;  %v1332_v28 = vmul.f32 %v1956_v10, %v1324_v30  ;;  %v1271_v54 = vmul.f32 0.3275911, %v1263_v62  ;;  %v1383_v11 = vsub.f32 0.0, %v1263_v62 }
 0x1e8   : > { %v1347_v57 = vmul.f32 %v1954_v42, %v1339_v50  ;;  %vm1422_vm11 = vcmp.ge.f32.partialorder %v2722_v56, 0.0  ;;  %vm1423_vm12 = vcmp.ge.f32.partialorder %v2736_v1, 0.0 }
 0x1e9   : > { %v1434_v48 = vsel %vm1418_vm7, %v1426_v40, %v1410_v26  ;;  %v1340_v32 = vadd.f32 -0.28449672, %v1332_v28  ;;  %v1279_v12 = vadd.f32 1.0, %v1271_v54  ;;  %v1391_v24 = vmul.f32 %v1383_v11, %v1263_v62 }
 0x1ea   : > { %v1442_v29 = vmul.f32 %v1434_v48, %v2608_v5  ;;  %v1355_v53 = vadd.f32 0.2548296, %v1347_v57  ;;  %v1390_v5 = vmul.f32 %v1382_v4, %v1262_v21 }
 0x1eb   : > { %v1958_v22 = vpop.eup %1957  ;;  %v1348_v0 = vmul.f32 %v1956_v10, %v1340_v32  ;;  %1965 = vrcp.f32 %v1279_v12  ;;  %v1406_v18 = vmul.f32 1.442695, %v1391_v24 }
 0x1ec   : > { %1866 = vmatprep.mubr.msk.f32.mxu1 %vm747_vm2, %v1442_v29  ;;  %v1363_v43 = vmul.f32 %v1954_v42, %v1355_v53  ;;  %v1301_v39 = vmul.f32 1.0614054, %v1958_v22  ;;  %1967 = vpow2.f32 %v1402_v16  ;;  %v1404_v13 = vmul.f32 1.442695, %v1390_v5 }
 0x1ed   : > { %v1356_v9 = vadd.f32 0.2548296, %v1348_v0 }
 0x1ee   : > { %v1371_v37 = vmul.f32 0.5, %v1363_v43  ;;  %v1309_v34 = vadd.f32 -1.4531521, %v1301_v39  ;;  %v1960_v15 = vpop.eup %1959  ;;  %1969 = vpow2.f32 %v1404_v13 }
 0x1ef   : > { %v1364_v45 = vmul.f32 %v1956_v10, %v1356_v9  ;;  %1971 = vpow2.f32 %v1406_v18 }
 0x1f0   : > { %v1411_v59 = vmul.f32 %v1960_v15, %v1371_v37  ;;  %v1317_v33 = vmul.f32 %v1958_v22, %v1309_v34  ;;  %v1797_v15 = vld [vmem:[%s2819_s10] ss:$0 sm:$0xff] }
 0x1f1   : > { %v1962_v52 = vpop.eup %1961  ;;  %v1372_v27 = vmul.f32 0.5, %v1364_v45 }
 0x1f2   : > { %v1964_v46 = vpop.eup %1963  ;;  %v1427_v60 = vsub.f32 1.0, %v1411_v59  ;;  %v1325_v36 = vadd.f32 1.4214138, %v1317_v33  ;;  %v1302_v38 = vmul.f32 1.0614054, %v1962_v52 }
 0x1f3   : > { %v1412_v42 = vmul.f32 %v1964_v46, %v1372_v27 }
 0x1f4   : > { %v1435_v31 = vsel %vm1419_vm8, %v1427_v60, %v1411_v59  ;;  %v1333_v41 = vmul.f32 %v1958_v22, %v1325_v36  ;;  %v1310_v51 = vadd.f32 -1.4531521, %v1302_v38  ;;  %v1973_v59 = vld [vmem:[%s2125_s24 + $0x8] sm:$0xff]  ;;  %v1975_v38 = vld [vmem:[%s2125_s24 + $0x18] sm:$0xff] }
 0x1f5   : > { %v1443_v10 = vmul.f32 %v1435_v31, %v2648_v17  ;;  %v1428_v2 = vsub.f32 1.0, %v1412_v42  ;;  %v1976_v31 = vld [vmem:[%s2125_s24 + $0x10] sm:$0xff] }
 0x1f6   : > { %v1341_v21 = vadd.f32 -0.28449672, %v1333_v41  ;;  %v1318_v35 = vmul.f32 %v1962_v52, %v1310_v51 }
 0x1f7   : > { %1867 = vmatmul.mubr.msk.f32.gmra.mxu1 %vm747_vm2, %v1443_v10  ;;  %v1436_v63 = vsel %vm1420_vm9, %v1428_v2, %v1412_v42  ;;  %v1977_v2 = vld [vmem:[%s2125_s24 + $0x28] sm:$0xff] }
 0x1f8   : > { %v1966_v19 = vpop.eup %1965  ;;  %v1444_v49 = vmul.f32 %v1436_v63, %v2662_v44  ;;  %v1349_v61 = vmul.f32 %v1958_v22, %v1341_v21  ;;  %v1326_v55 = vadd.f32 1.4214138, %v1318_v35  ;;  %v1978_v63 = vld [vmem:[%s2125_s24 + $0x20] sm:$0xff] }
 0x1f9   : > { %v1303_v8 = vmul.f32 1.0614054, %v1966_v19  ;;  %v1968_v30 = vpop.eup %1967 }
 0x1fa   : > { %1869 = vmatprep.mubr.msk.f32.mxu1 %vm747_vm2, %v1444_v49  ;;  %v1357_v3 = vadd.f32 0.2548296, %v1349_v61  ;;  %v1334_v17 = vmul.f32 %v1962_v52, %v1326_v55  ;;  %v1979_v55 = vld [vmem:[%s2125_s24 + $0x38] sm:$0xff] }
 0x1fb   : > { %v1311_v25 = vadd.f32 -1.4531521, %v1303_v8  ;;  %v1970_v32 = vpop.eup %1969 }
 0x1fc   : > { %v1365_v7 = vmul.f32 %v1958_v22, %v1357_v3  ;;  %v1342_v20 = vadd.f32 -0.28449672, %v1334_v17  ;;  %v1972_v9 = vpop.eup %1971  ;;  %v1980_v17 = vld [vmem:[%s2125_s24 + $0x30] sm:$0xff] }
 0x1fd   : > { %v1319_v47 = vmul.f32 %v1966_v19, %v1311_v25 }
 0x1fe   : > { %v1373_v23 = vmul.f32 0.5, %v1365_v7  ;;  %v1350_v26 = vmul.f32 %v1962_v52, %v1342_v20 }
 0x1ff   : > { %v1327_v62 = vadd.f32 1.4214138, %v1319_v47 }
 0x200   : > { %v1413_v50 = vmul.f32 %v1968_v30, %v1373_v23  ;;  %v1358_v44 = vadd.f32 0.2548296, %v1350_v26 }
 0x201   : > { %v1335_v6 = vmul.f32 %v1966_v19, %v1327_v62 }
 0x202   : > { %v1429_v40 = vsub.f32 1.0, %v1413_v50  ;;  %v1366_v28 = vmul.f32 %v1962_v52, %v1358_v44  ;;  %v1974_v52 = vld [vmem:[%s2125_s24] sm:$0xff] }
 0x203   : > { %v1343_v54 = vadd.f32 -0.28449672, %v1335_v6 }
 0x204   : > { %v1437_v57 = vsel %vm1421_vm10, %v1429_v40, %v1413_v50  ;;  %v1374_v48 = vmul.f32 0.5, %v1366_v28 }
 0x205   : > { %v1445_v12 = vmul.f32 %v1437_v57, %v2702_v14  ;;  %v1351_v29 = vmul.f32 %v1966_v19, %v1343_v54 }
 0x206   : > { %v1414_v53 = vmul.f32 %v1970_v32, %v1374_v48 }
 0x207   : > { %1870 = vmatmul.mubr.msk.f32.gmra.mxu1 %vm747_vm2, %v1445_v12  ;;  %v1359_v58 = vadd.f32 0.2548296, %v1351_v29 }
 0x208   : > { %v1430_v22 = vsub.f32 1.0, %v1414_v53 }
 0x209   : > { %v1367_v0 = vmul.f32 %v1966_v19, %v1359_v58 }
 0x20a   : > { %v1438_v43 = vsel %vm1422_vm11, %v1430_v22, %v1414_v53 }
 0x20b   : > { %v1446_v39 = vmul.f32 %v1438_v43, %v2722_v56  ;;  %v1375_v4 = vmul.f32 0.5, %v1367_v0 }
 0x20d   : > { %1872 = vmatprep.mubr.msk.f32.mxu1 %vm747_vm2, %v1446_v39  ;;  %v1415_v14 = vmul.f32 %v1972_v9, %v1375_v4 }
 0x20f   : > { %v1431_v37 = vsub.f32 1.0, %v1415_v14 }
 0x211   : > { %v1439_v34 = vsel %vm1423_vm12, %v1431_v37, %v1415_v14 }
 0x212   : > { %v1447_v16 = vmul.f32 %v1439_v34, %v2736_v1 }
 0x214   : > { %1873 = vmatmul.mubr.msk.f32.gmra.mxu1 %vm747_vm2, %v1447_v16 }
 0x2a2   : > { %v1865_v56 = vpop.f32.mrf.mxu1 }
 0x2a3   : > { %v1553_v45 = vadd.f32 %v1865_v56, %v1797_v15 }
 0x2a4   : > { %v1547_v1 = vpop.f32.mrf.mxu1 }
 0x2a5   : > { %v1587_v33 = vadd.f32 %v1973_v59, %v1553_v45  ;;  %v1548_v5 = vadd.f32 %v1797_v15, %v1547_v1 }
 0x2a7   : > { %1595 = vst.msk [vmem:[%s2768_s30 + $0x8] sm:$0xff] %vm581_vm1, %v1587_v33  ;;  %v1586_v27 = vadd.f32 %v1974_v52, %v1548_v5 }
 0x2a9   : > { %1594 = vst.msk [vmem:[%s2768_s30] sm:$0xff] %vm581_vm1, %v1586_v27 }
 0x2b7   : > { %v1868_v46 = vpop.f32.mrf.mxu1 }
 0x2b8   : > { %v1563_v60 = vadd.f32 %v1868_v46, %v1797_v15 }
 0x2b9   : > { %v1557_v36 = vpop.f32.mrf.mxu1 }
 0x2ba   : > { %v1589_v42 = vadd.f32 %v1975_v38, %v1563_v60  ;;  %v1558_v11 = vadd.f32 %v1797_v15, %v1557_v36 }
 0x2bc   : > { %1597 = vst.msk [vmem:[%s2768_s30 + $0x18] sm:$0xff] %vm581_vm1, %v1589_v42  ;;  %v1588_v41 = vadd.f32 %v1976_v31, %v1558_v11 }
 0x2be   : > { %1596 = vst.msk [vmem:[%s2768_s30 + $0x10] sm:$0xff] %vm581_vm1, %v1588_v41 }
 0x2c7   : > { %v1871_v51 = vpop.f32.mrf.mxu1 }
 0x2c8   : > { %v1573_v13 = vadd.f32 %v1871_v51, %v1797_v15 }
 0x2c9   : > { %v1567_v10 = vpop.f32.mrf.mxu1 }
 0x2ca   : > { %v1591_v21 = vadd.f32 %v1977_v2, %v1573_v13  ;;  %v1568_v35 = vadd.f32 %v1797_v15, %v1567_v10 }
 0x2cc   : > { %1599 = vst.msk [vmem:[%s2768_s30 + $0x28] sm:$0xff] %vm581_vm1, %v1591_v21  ;;  %v1590_v24 = vadd.f32 %v1978_v63, %v1568_v35 }
 0x2ce   : > { %1598 = vst.msk [vmem:[%s2768_s30 + $0x20] sm:$0xff] %vm581_vm1, %v1590_v24 }
 0x2d4   : > { %v1874_v19 = vpop.f32.mrf.mxu1 }
 0x2d5   : > { %v1583_v49 = vadd.f32 %v1874_v19, %v1797_v15 }
 0x2d6   : > { %v1577_v61 = vpop.f32.mrf.mxu1 }
 0x2d7   : > { %v1593_v8 = vadd.f32 %v1979_v55, %v1583_v49  ;;  %v1578_v3 = vadd.f32 %v1797_v15, %v1577_v61 }
 0x2d9   : > { %1601 = vst.msk [vmem:[%s2768_s30 + $0x38] sm:$0xff] %vm581_vm1, %v1593_v8  ;;  %v1592_v25 = vadd.f32 %v1980_v17, %v1578_v3 }
 0x2db   : > { %1600 = vst.msk [vmem:[%s2768_s30 + $0x30] sm:$0xff] %vm581_vm1, %v1592_v25 }
 0x2dc PF: > { %s21_s21 = sadd.s32 1, %s2019_s21   ;;  %s2827_s18 = sld [smem:[#allocation2_spill]] }
 0x2dd   : > { %p18_p12 = scmp.ge.s32.totalorder %s21_s21, 10   ;;  %s2828_s12 = sld [smem:[#allocation3_spill]] }
 0x2de   : > { %s2829_s20 = sld [smem:[#allocation4_spill]]  ;;  %s2830_s17 = smov %s2011_s19 }
 0x2df   :  { %20 = sbr.rel (!%p18_p12) target bundleno = 3 (0x3), region = 100 }
 0x2e3   : > { %s2831_s19 = smov %s2828_s12 }

</bundles_post_ra>
